<compile_context>
chip_gen: v7x
topology: tpu7x:2x2x1
jax: 0.10.0
libtpu: 0.0.40
codegen_flags: <defaults>
</compile_context>

<pallas_src>
import functools
import math

import jax
import jax.numpy as jnp
from jax import lax
from jax.experimental import pallas as pl
from jax.experimental.pallas import tpu as pltpu

_INV_SQRT2 = 1.0 / math.sqrt(2.0)


def _round_up(x, m):
    return ((x + m - 1) // m) * m


def _erf(x):
    """erf via Abramowitz & Stegun 7.1.26 (max abs error 1.5e-7).

    Uses only VPU ops + one EUP exp, so it lowers cleanly in Mosaic.
    """
    a1, a2, a3, a4, a5 = (0.254829592, -0.284496736, 1.421413741,
                          -1.453152027, 1.061405429)
    p = 0.3275911
    ax = jnp.abs(x)
    t = 1.0 / (1.0 + p * ax)
    poly = ((((a5 * t + a4) * t + a3) * t + a2) * t + a1) * t
    y = 1.0 - poly * jnp.exp(-(ax * ax))
    return jnp.where(x >= 0.0, y, -y)


# ------------- fully fused fc1 + dwconv3x3 + bias + GELU + fc2 kernel ------------- #

def _mlp_fused_kernel(xm_ref, xt_ref, xb_ref, w1_ref, b1_ref, dw_ref, dwb_ref,
                      w2_ref, b2_ref, o_ref, hpad_ref, *, tH, W):
    j = pl.program_id(1)
    n_h = pl.num_programs(1)
    Ci = xm_ref.shape[-1]
    Ch = w1_ref.shape[1]
    adt = hpad_ref.dtype

    w1 = w1_ref[...]
    b1 = b1_ref[...].astype(jnp.float32)                 # (1, Ch)

    # ---- fc1 for this tile's tH rows (MXU, f32 accumulation); w1 resident in VMEM ----
    xm = xm_ref[...].reshape(tH * W, Ci)
    h_main = jnp.dot(xm, w1, preferred_element_type=jnp.float32) + b1

    # ---- assemble the zero-padded (tH+2, W+2, Ch) hidden window in a VMEM scratch ----
    # Everything the conv reads is rewritten every grid step, so each grid point is
    # independent (megacore-safe with both axes "parallel").
    hpad_ref[:, 0:1, :] = jnp.zeros((tH + 2, 1, Ch), adt)           # left zero column
    hpad_ref[:, W + 1:W + 2, :] = jnp.zeros((tH + 2, 1, Ch), adt)   # right zero column
    hpad_ref[1:tH + 1, 1:W + 1, :] = h_main.reshape(tH, W, Ch).astype(adt)

    # Top halo row: recompute fc1 for the neighbour row, zeros at the image edge.
    # pl.when (select on the store) avoids the 0*Inf -> NaN hazard of mask-multiply.
    @pl.when(j == 0)
    def _():
        hpad_ref[0:1, 1:W + 1, :] = jnp.zeros((1, W, Ch), adt)

    @pl.when(j > 0)
    def _():
        ht = jnp.dot(xt_ref[...], w1, preferred_element_type=jnp.float32) + b1
        hpad_ref[0:1, 1:W + 1, :] = ht.reshape(1, W, Ch).astype(adt)

    # Bottom halo row.
    @pl.when(j == n_h - 1)
    def _():
        hpad_ref[tH + 1:tH + 2, 1:W + 1, :] = jnp.zeros((1, W, Ch), adt)

    @pl.when(j < n_h - 1)
    def _():
        hb = jnp.dot(xb_ref[...], w1, preferred_element_type=jnp.float32) + b1
        hpad_ref[tH + 1:tH + 2, 1:W + 1, :] = hb.reshape(1, W, Ch).astype(adt)

    # ---- 9-tap depthwise conv + bias (f32 accumulation, taps unrolled) ----
    w9 = dw_ref[...].astype(jnp.float32)                 # (9, Ch), lane-dense
    acc = jnp.zeros((tH, W, Ch), jnp.float32)
    for t in range(9):
        dy, dx = divmod(t, 3)
        acc = acc + hpad_ref[dy:dy + tH, dx:dx + W, :].astype(jnp.float32) * w9[t, :]
    y = acc + dwb_ref[...].astype(jnp.float32)

    # ---- exact (erf) GELU, matching nn.GELU() default ----
    g = 0.5 * y * (1.0 + _erf(y * _INV_SQRT2))

    # ---- fc2 on the MXU; output block is lane-dense (Cout padded to 128 multiple) ----
    g2 = g.reshape(tH * W, Ch).astype(w2_ref.dtype)
    out = jnp.dot(g2, w2_ref[...], preferred_element_type=jnp.float32)
    out = out + b2_ref[...].astype(jnp.float32)
    o_ref[...] = out.astype(o_ref.dtype)


def _pick_row_tile(H, W, max_tokens):
    """Largest divisor tH of H with tH*W <= max_tokens and sublane-friendly token
    count (tH*W % 8 == 0); falls back to the smallest valid divisor."""
    valid = [t for t in range(1, H + 1)
             if H % t == 0 and ((t * W) % 8 == 0 or t == H)]
    small = [t for t in valid if t * W <= max_tokens]
    return max(small) if small else min(valid)


def _vmem_estimate(tH, W, Ci, Ch, Co, isz, osz):
    tokens = tH * W
    wp = _round_up(W + 2, 8)
    weights = (Ci * Ch + Ch + 9 * Ch + Ch + Ch * Co + Co) * isz
    return int(2 * tokens * Ci * isz            # main x block (double-buffered)
               + 4 * W * Ci * isz               # halo row blocks (double-buffered)
               + 2 * weights                    # resident weights (counted x2)
               + 2 * tokens * Co * osz          # output block (double-buffered)
               + (tH + 2) * wp * Ch * isz       # padded hidden scratch
               + 4 * tokens * Ch * 4            # f32 live temps (fc1 / conv / gelu)
               + tokens * Co * 4)               # f32 fc2 accumulator


def mlp_fused(x_nhwc, w1, b1, dw9, dwb, w2, b2, *, max_tokens=1024,
              out_dtype=None, vmem_budget=48 * 1024 * 1024):
    """Fused fc1 -> depthwise 3x3 (stride 1, pad 1) -> GELU -> fc2.

    x_nhwc: (B, H, W, Ci).  hidden (= w1.shape[1]) and Cout (= w2.shape[1]) must be
    multiples of 128 (pad in the caller).  Returns (B, H*W, Cout), row-major tokens.
    """
    B, H, W, Ci = x_nhwc.shape
    Ch = w1.shape[1]
    Co = w2.shape[1]
    out_dtype = out_dtype or x_nhwc.dtype
    isz = x_nhwc.dtype.itemsize
    osz = jnp.dtype(out_dtype).itemsize

    # Row-tile selection; shrink until the per-step working set respects the VMEM
    # budget (v7x: 64 MiB physical / 32 MiB scoped per TensorCore).
    mt = max_tokens
    tH = _pick_row_tile(H, W, mt)
    while _vmem_estimate(tH, W, Ci, Ch, Co, isz, osz) > vmem_budget and mt > W:
        mt = max(W, mt // 2)
        new_tH = _pick_row_tile(H, W, mt)
        if new_tH == tH:
            break
        tH = new_tH
    n_h = H // tH
    tokens = tH * W
    Wp = _round_up(W + 2, 8)        # sublane-aligned scratch width

    vmem_est = _vmem_estimate(tH, W, Ci, Ch, Co, isz, osz)
    vmem_limit = min(max(32 * 1024 * 1024, int(1.35 * vmem_est)), 64 * 1024 * 1024)

    flops = (2 * B * H * W * Ci * Ch                        # fc1 (main rows)
             + 2 * B * 2 * max(n_h - 1, 0) * W * Ci * Ch    # fc1 halo recompute
             + 18 * B * H * W * Ch                          # 3x3 depthwise conv
             + 2 * B * H * W * Ch * Co)                     # fc2
    cost = pl.CostEstimate(
        flops=int(flops),
        transcendentals=int(B * H * W * Ch),
        bytes_accessed=int((B * (H + 2 * n_h) * W * Ci
                            + Ci * Ch + 11 * Ch + Ch * Co + Co) * isz
                           + B * H * W * Co * osz),
    )

    kernel = functools.partial(_mlp_fused_kernel, tH=tH, W=W)

    return pl.pallas_call(
        kernel,
        out_shape=jax.ShapeDtypeStruct((B, H * W, Co), out_dtype),
        grid=(B, n_h),
        in_specs=[
            # main tH rows of this tile (batch dim squeezed)
            pl.BlockSpec((None, tH, W, Ci), lambda b, j: (b, j, 0, 0)),
            # 1-row top / bottom halos; index clamped at the image edge (the edge case
            # itself is handled with pl.when inside the kernel)
            pl.BlockSpec((None, None, W, Ci),
                         lambda b, j: (b, jnp.maximum(j * tH - 1, 0), 0, 0)),
            pl.BlockSpec((None, None, W, Ci),
                         lambda b, j: (b, jnp.minimum(j * tH + tH, H - 1), 0, 0)),
            pl.BlockSpec((Ci, Ch), lambda b, j: (0, 0)),     # w1 (resident in VMEM)
            pl.BlockSpec((1, Ch), lambda b, j: (0, 0)),      # b1
            pl.BlockSpec((9, Ch), lambda b, j: (0, 0)),      # dw weights (lane-dense)
            pl.BlockSpec((1, Ch), lambda b, j: (0, 0)),      # dw bias
            pl.BlockSpec((Ch, Co), lambda b, j: (0, 0)),     # w2 (resident in VMEM)
            pl.BlockSpec((1, Co), lambda b, j: (0, 0)),      # b2
        ],
        out_specs=pl.BlockSpec((None, tokens, Co), lambda b, j: (b, j, 0)),
        scratch_shapes=[pltpu.VMEM((tH + 2, Wp, Ch), x_nhwc.dtype)],
        compiler_params=pltpu.CompilerParams(
            dimension_semantics=("parallel", "parallel"),
            vmem_limit_bytes=vmem_limit,
        ),
        cost_estimate=cost,
    )(x_nhwc, x_nhwc, x_nhwc, w1, b1, dw9, dwb, w2, b2)


# ----------------------------------- Mlp forward ----------------------------------- #

def mlp_forward(x, params, H, W, *, max_tokens=1024):
    """x: (B, N, C_in) with N == H*W (row-major over H then W). Returns (B, N, C_out)."""
    B, N, Ci = x.shape
    assert N == H * W
    hidden = params["w1"].shape[1]
    Cout = params["w2"].shape[1]
    Chp = _round_up(hidden, 128)
    Cop = _round_up(Cout, 128)

    # Pad hidden / out dims to lane-dense multiples of 128 on the (small) weight side
    # only.  Zero-padded hidden channels stay exactly zero through dwconv+GELU and
    # contribute nothing to fc2; padded output columns are sliced off below.
    w1, b1 = params["w1"], params["b1"]
    dw9 = params["dw_w"].reshape(9, hidden)
    dwb = params["dw_b"]
    w2, b2 = params["w2"], params["b2"]
    if Chp != hidden:
        w1 = jnp.pad(w1, ((0, 0), (0, Chp - hidden)))
        b1 = jnp.pad(b1, (0, Chp - hidden))
        dw9 = jnp.pad(dw9, ((0, 0), (0, Chp - hidden)))
        dwb = jnp.pad(dwb, (0, Chp - hidden))
        w2 = jnp.pad(w2, ((0, Chp - hidden), (0, 0)))
    if Cop != Cout:
        w2 = jnp.pad(w2, ((0, 0), (0, Cop - Cout)))
        b2 = jnp.pad(b2, (0, Cop - Cout))

    out = mlp_fused(x.reshape(B, H, W, Ci), w1, b1.reshape(1, Chp), dw9,
                    dwb.reshape(1, Chp), w2, b2.reshape(1, Cop),
                    max_tokens=max_tokens, out_dtype=x.dtype)
    return out[:, :, :Cout] if Cop != Cout else out


def make_params(key, in_features, hidden_features, out_features, dtype=jnp.float32):
    k1, k2, k3 = jax.random.split(key, 3)
    # Linear weights: trunc_normal(std=0.02), biases zero (as in _init_weights)
    w1 = 0.02 * jax.random.truncated_normal(k1, -2.0, 2.0,
                                            (in_features, hidden_features), dtype)
    w2 = 0.02 * jax.random.truncated_normal(k2, -2.0, 2.0,
                                            (hidden_features, out_features), dtype)
    # Depthwise conv: normal(0, sqrt(2 / fan_out)), fan_out = 3*3*C/groups = 9
    dw_w = math.sqrt(2.0 / 9.0) * jax.random.normal(k3, (3, 3, hidden_features), dtype)
    return dict(
        w1=w1, b1=jnp.zeros((hidden_features,), dtype),
        dw_w=dw_w, dw_b=jnp.zeros((hidden_features,), dtype),
        w2=w2, b2=jnp.zeros((out_features,), dtype),
    )


# --------------------------------- plain-JAX reference ------------------------------ #

def mlp_reference(x, params, H, W):
    B, N, C_in = x.shape
    hidden = params["w1"].shape[1]
    h = x.reshape(B * N, C_in) @ params["w1"] + params["b1"]
    h = h.reshape(B, H, W, hidden)
    h = lax.conv_general_dilated(
        h, params["dw_w"].reshape(3, 3, 1, hidden),
        window_strides=(1, 1), padding=((1, 1), (1, 1)),
        dimension_numbers=("NHWC", "HWIO", "NHWC"),
        feature_group_count=hidden,
    ) + params["dw_b"]
    h = jax.nn.gelu(h, approximate=False)
    out = h.reshape(B * N, hidden) @ params["w2"] + params["b2"]
    return out.reshape(B, N, -1)


if __name__ == "__main__":
    key = jax.random.PRNGKey(0)
    kx, kp = jax.random.split(key)

    B, H, W = 2, 16, 16
    N = H * W
    in_features, hidden_features = 64, 128
    out_features = in_features          # Cout=64 < 128 exercises lane-dense padding

    x = jax.random.normal(kx, (B, N, in_features), jnp.float32)
    params = make_params(kp, in_features, hidden_features, out_features)

    ref = mlp_reference(x, params, H, W)

    # multi-row-tile path (n_h = 2): exercises the clamped halo index_map, the
    # pl.when boundary masking, and the halo fc1 recompute
    out_tiled = jax.block_until_ready(mlp_forward(x, params, H, W, max_tokens=128))
    # default tiling: whole image in one block (n_h = 1, both halos zeroed)
    out_full = jax.block_until_ready(mlp_forward(x, params, H, W))

    assert out_tiled.shape == (B, N, out_features)
    assert out_full.shape == (B, N, out_features)
    assert jnp.allclose(out_tiled, ref, atol=2e-3, rtol=2e-3), \
        float(jnp.max(jnp.abs(out_tiled - ref)))
    assert jnp.allclose(out_full, ref, atol=2e-3, rtol=2e-3), \
        float(jnp.max(jnp.abs(out_full - ref)))

    print("KERNEL_OK")
</pallas_src>

<mosaic_0001>
module attributes {stable_mosaic.version = 11 : i64} {
  func.func @_mlp_fused_kernel(%arg0: i32, %arg1: i32, %arg2: memref<1x8x16x64xf32, #tpu.memory_space<vmem>>, %arg3: memref<1x1x16x64xf32, #tpu.memory_space<vmem>>, %arg4: memref<1x1x16x64xf32, #tpu.memory_space<vmem>>, %arg5: memref<64x128xf32, #tpu.memory_space<vmem>>, %arg6: memref<1x128xf32, #tpu.memory_space<vmem>>, %arg7: memref<9x128xf32, #tpu.memory_space<vmem>>, %arg8: memref<1x128xf32, #tpu.memory_space<vmem>>, %arg9: memref<128x128xf32, #tpu.memory_space<vmem>>, %arg10: memref<1x128xf32, #tpu.memory_space<vmem>>, %arg11: memref<1x128x128xf32, #tpu.memory_space<vmem>>, %arg12: memref<10x24x128xf32, #tpu.memory_space<vmem>>) attributes {dimension_semantics = [#tpu.dimension_semantics<parallel>, #tpu.dimension_semantics<parallel>], iteration_bounds = array<i64: 2, 2>, scalar_prefetch = 0 : i64, scratch_operands = 1 : i64, tpu.core_type = #tpu.core_type<tc>, window_params = [{transform_indices = @transform_0, window_bounds = array<i64: 1, 8, 16, 64>}, {transform_indices = @transform_1, window_bounds = array<i64: 1, 1, 16, 64>}, {transform_indices = @transform_2, window_bounds = array<i64: 1, 1, 16, 64>}, {pipeline_mode = #tpu.pipeline_mode<synchronous>, transform_indices = @transform_3, window_bounds = array<i64: 64, 128>}, {pipeline_mode = #tpu.pipeline_mode<synchronous>, transform_indices = @transform_4, window_bounds = array<i64: 1, 128>}, {pipeline_mode = #tpu.pipeline_mode<synchronous>, transform_indices = @transform_5, window_bounds = array<i64: 9, 128>}, {pipeline_mode = #tpu.pipeline_mode<synchronous>, transform_indices = @transform_6, window_bounds = array<i64: 1, 128>}, {pipeline_mode = #tpu.pipeline_mode<synchronous>, transform_indices = @transform_7, window_bounds = array<i64: 128, 128>}, {pipeline_mode = #tpu.pipeline_mode<synchronous>, transform_indices = @transform_8, window_bounds = array<i64: 1, 128>}, {transform_indices = @transform_9, window_bounds = array<i64: 1, 128, 128>}]} {
    %c0 = arith.constant 0 : index
    %c0_0 = arith.constant 0 : index
    %0 = vector.load %arg5[%c0, %c0_0] : memref<64x128xf32, #tpu.memory_space<vmem>>, vector<64x128xf32>
    %c0_1 = arith.constant 0 : index
    %c0_2 = arith.constant 0 : index
    %1 = vector.load %arg6[%c0_1, %c0_2] : memref<1x128xf32, #tpu.memory_space<vmem>>, vector<1x128xf32>
    %c0_3 = arith.constant 0 : index
    %c0_4 = arith.constant 0 : index
    %c0_5 = arith.constant 0 : index
    %c0_6 = arith.constant 0 : index
    %2 = vector.load %arg2[%c0_3, %c0_4, %c0_5, %c0_6] : memref<1x8x16x64xf32, #tpu.memory_space<vmem>>, vector<1x8x16x64xf32>
    %3 = vector.shape_cast %2 : vector<1x8x16x64xf32> to vector<8x16x64xf32>
    %4 = vector.shape_cast %3 : vector<8x16x64xf32> to vector<128x64xf32>
    %cst = arith.constant dense<0.000000e+00> : vector<128x128xf32>
    %5 = tpu.matmul %4, %0, %cst {dimension_numbers = #tpu.dot_dimension_numbers<[1], [0], [0], [1], [0, 0, 1, 1], [], []>} : vector<128x64xf32>, vector<64x128xf32>, vector<128x128xf32> -> vector<128x128xf32>
    %6 = vector.broadcast %1 : vector<1x128xf32> to vector<128x128xf32>
    %7 = arith.addf %5, %6 : vector<128x128xf32>
    %cst_7 = arith.constant 0.000000e+00 : f32
    %8 = vector.broadcast %cst_7 : f32 to vector<10x1x128xf32>
    %c0_8 = arith.constant 0 : index
    %c0_9 = arith.constant 0 : index
    %c0_10 = arith.constant 0 : index
    %9 = vector.load %arg12[%c0_8, %c0_9, %c0_10] : memref<10x24x128xf32, #tpu.memory_space<vmem>>, vector<10x1x128xf32>
    tpu.vector_store %arg12[%c0_8, %c0_9, %c0_10], %8 {strides = array<i32>} : memref<10x24x128xf32, #tpu.memory_space<vmem>>, vector<10x1x128xf32>,
    %cst_11 = arith.constant 0.000000e+00 : f32
    %10 = vector.broadcast %cst_11 : f32 to vector<10x1x128xf32>
    %c0_12 = arith.constant 0 : index
    %c17 = arith.constant 17 : index
    %c0_13 = arith.constant 0 : index
    %11 = vector.load %arg12[%c0_12, %c17, %c0_13] : memref<10x24x128xf32, #tpu.memory_space<vmem>>, vector<10x1x128xf32>
    tpu.vector_store %arg12[%c0_12, %c17, %c0_13], %10 {strides = array<i32>} : memref<10x24x128xf32, #tpu.memory_space<vmem>>, vector<10x1x128xf32>,
    %12 = vector.shape_cast %7 : vector<128x128xf32> to vector<8x16x128xf32>
    %c1 = arith.constant 1 : index
    %c1_14 = arith.constant 1 : index
    %c0_15 = arith.constant 0 : index
    %13 = vector.load %arg12[%c1, %c1_14, %c0_15] : memref<10x24x128xf32, #tpu.memory_space<vmem>>, vector<8x16x128xf32>
    tpu.vector_store %arg12[%c1, %c1_14, %c0_15], %12 {strides = array<i32>} : memref<10x24x128xf32, #tpu.memory_space<vmem>>, vector<8x16x128xf32>,
    %c0_i32 = arith.constant 0 : i32
    %14 = arith.cmpi eq, %arg1, %c0_i32 : i32
    %15 = arith.extui %14 : i1 to i32
    %c0_i32_16 = arith.constant 0 : i32
    %16 = arith.cmpi ne, %15, %c0_i32_16 : i32
    scf.if %16 {
      %cst_76 = arith.constant 0.000000e+00 : f32
      %144 = vector.broadcast %cst_76 : f32 to vector<1x16x128xf32>
      %c0_77 = arith.constant 0 : index
      %c1_78 = arith.constant 1 : index
      %c0_79 = arith.constant 0 : index
      %145 = vector.load %arg12[%c0_77, %c1_78, %c0_79] : memref<10x24x128xf32, #tpu.memory_space<vmem>>, vector<1x16x128xf32>
      tpu.vector_store %arg12[%c0_77, %c1_78, %c0_79], %144 {strides = array<i32>} : memref<10x24x128xf32, #tpu.memory_space<vmem>>, vector<1x16x128xf32>,
    } else {
    }
    %c0_i32_17 = arith.constant 0 : i32
    %17 = arith.cmpi sgt, %arg1, %c0_i32_17 : i32
    %18 = arith.extui %17 : i1 to i32
    %c0_i32_18 = arith.constant 0 : i32
    %19 = arith.cmpi ne, %18, %c0_i32_18 : i32
    scf.if %19 {
      %c0_76 = arith.constant 0 : index
      %c0_77 = arith.constant 0 : index
      %c0_78 = arith.constant 0 : index
      %c0_79 = arith.constant 0 : index
      %144 = vector.load %arg3[%c0_76, %c0_77, %c0_78, %c0_79] : memref<1x1x16x64xf32, #tpu.memory_space<vmem>>, vector<1x1x16x64xf32>
      %145 = vector.shape_cast %144 : vector<1x1x16x64xf32> to vector<16x64xf32>
      %cst_80 = arith.constant dense<0.000000e+00> : vector<16x128xf32>
      %146 = tpu.matmul %145, %0, %cst_80 {dimension_numbers = #tpu.dot_dimension_numbers<[1], [0], [0], [1], [0, 0, 1, 1], [], []>} : vector<16x64xf32>, vector<64x128xf32>, vector<16x128xf32> -> vector<16x128xf32>
      %147 = vector.broadcast %1 : vector<1x128xf32> to vector<16x128xf32>
      %148 = arith.addf %146, %147 : vector<16x128xf32>
      %149 = vector.shape_cast %148 : vector<16x128xf32> to vector<1x16x128xf32>
      %c0_81 = arith.constant 0 : index
      %c1_82 = arith.constant 1 : index
      %c0_83 = arith.constant 0 : index
      %150 = vector.load %arg12[%c0_81, %c1_82, %c0_83] : memref<10x24x128xf32, #tpu.memory_space<vmem>>, vector<1x16x128xf32>
      tpu.vector_store %arg12[%c0_81, %c1_82, %c0_83], %149 {strides = array<i32>} : memref<10x24x128xf32, #tpu.memory_space<vmem>>, vector<1x16x128xf32>,
    } else {
    }
    %c1_i32 = arith.constant 1 : i32
    %20 = arith.cmpi eq, %arg1, %c1_i32 : i32
    %21 = arith.extui %20 : i1 to i32
    %c0_i32_19 = arith.constant 0 : i32
    %22 = arith.cmpi ne, %21, %c0_i32_19 : i32
    scf.if %22 {
      %cst_76 = arith.constant 0.000000e+00 : f32
      %144 = vector.broadcast %cst_76 : f32 to vector<1x16x128xf32>
      %c9 = arith.constant 9 : index
      %c1_77 = arith.constant 1 : index
      %c0_78 = arith.constant 0 : index
      %145 = vector.load %arg12[%c9, %c1_77, %c0_78] : memref<10x24x128xf32, #tpu.memory_space<vmem>>, vector<1x16x128xf32>
      tpu.vector_store %arg12[%c9, %c1_77, %c0_78], %144 {strides = array<i32>} : memref<10x24x128xf32, #tpu.memory_space<vmem>>, vector<1x16x128xf32>,
    } else {
    }
    %c1_i32_20 = arith.constant 1 : i32
    %23 = arith.cmpi slt, %arg1, %c1_i32_20 : i32
    %24 = arith.extui %23 : i1 to i32
    %c0_i32_21 = arith.constant 0 : i32
    %25 = arith.cmpi ne, %24, %c0_i32_21 : i32
    scf.if %25 {
      %c0_76 = arith.constant 0 : index
      %c0_77 = arith.constant 0 : index
      %c0_78 = arith.constant 0 : index
      %c0_79 = arith.constant 0 : index
      %144 = vector.load %arg4[%c0_76, %c0_77, %c0_78, %c0_79] : memref<1x1x16x64xf32, #tpu.memory_space<vmem>>, vector<1x1x16x64xf32>
      %145 = vector.shape_cast %144 : vector<1x1x16x64xf32> to vector<16x64xf32>
      %cst_80 = arith.constant dense<0.000000e+00> : vector<16x128xf32>
      %146 = tpu.matmul %145, %0, %cst_80 {dimension_numbers = #tpu.dot_dimension_numbers<[1], [0], [0], [1], [0, 0, 1, 1], [], []>} : vector<16x64xf32>, vector<64x128xf32>, vector<16x128xf32> -> vector<16x128xf32>
      %147 = vector.broadcast %1 : vector<1x128xf32> to vector<16x128xf32>
      %148 = arith.addf %146, %147 : vector<16x128xf32>
      %149 = vector.shape_cast %148 : vector<16x128xf32> to vector<1x16x128xf32>
      %c9 = arith.constant 9 : index
      %c1_81 = arith.constant 1 : index
      %c0_82 = arith.constant 0 : index
      %150 = vector.load %arg12[%c9, %c1_81, %c0_82] : memref<10x24x128xf32, #tpu.memory_space<vmem>>, vector<1x16x128xf32>
      tpu.vector_store %arg12[%c9, %c1_81, %c0_82], %149 {strides = array<i32>} : memref<10x24x128xf32, #tpu.memory_space<vmem>>, vector<1x16x128xf32>,
    } else {
    }
    %c0_22 = arith.constant 0 : index
    %c0_23 = arith.constant 0 : index
    %26 = vector.load %arg7[%c0_22, %c0_23] : memref<9x128xf32, #tpu.memory_space<vmem>>, vector<9x128xf32>
    %cst_24 = arith.constant 0.000000e+00 : f32
    %27 = vector.broadcast %cst_24 : f32 to vector<8x16x128xf32>
    %c0_25 = arith.constant 0 : index
    %c0_26 = arith.constant 0 : index
    %c0_27 = arith.constant 0 : index
    %28 = vector.load %arg12[%c0_25, %c0_26, %c0_27] : memref<10x24x128xf32, #tpu.memory_space<vmem>>, vector<8x16x128xf32>
    %29 = vector.extract_strided_slice %26 {offsets = [0, 0], sizes = [1, 128], strides = [1, 1]} : vector<9x128xf32> to vector<1x128xf32>
    %30 = vector.shape_cast %29 : vector<1x128xf32> to vector<128xf32>
    %31 = vector.shape_cast %30 : vector<128xf32> to vector<1x1x128xf32>
    %32 = vector.broadcast %31 : vector<1x1x128xf32> to vector<8x16x128xf32>
    %33 = arith.mulf %28, %32 : vector<8x16x128xf32>
    %34 = arith.addf %27, %33 : vector<8x16x128xf32>
    %c0_28 = arith.constant 0 : index
    %c1_29 = arith.constant 1 : index
    %c0_30 = arith.constant 0 : index
    %35 = vector.load %arg12[%c0_28, %c1_29, %c0_30] : memref<10x24x128xf32, #tpu.memory_space<vmem>>, vector<8x16x128xf32>
    %36 = vector.extract_strided_slice %26 {offsets = [1, 0], sizes = [1, 128], strides = [1, 1]} : vector<9x128xf32> to vector<1x128xf32>
    %37 = vector.shape_cast %36 : vector<1x128xf32> to vector<128xf32>
    %38 = vector.shape_cast %37 : vector<128xf32> to vector<1x1x128xf32>
    %39 = vector.broadcast %38 : vector<1x1x128xf32> to vector<8x16x128xf32>
    %40 = arith.mulf %35, %39 : vector<8x16x128xf32>
    %41 = arith.addf %34, %40 : vector<8x16x128xf32>
    %c0_31 = arith.constant 0 : index
    %c2 = arith.constant 2 : index
    %c0_32 = arith.constant 0 : index
    %42 = vector.load %arg12[%c0_31, %c2, %c0_32] : memref<10x24x128xf32, #tpu.memory_space<vmem>>, vector<8x16x128xf32>
    %43 = vector.extract_strided_slice %26 {offsets = [2, 0], sizes = [1, 128], strides = [1, 1]} : vector<9x128xf32> to vector<1x128xf32>
    %44 = vector.shape_cast %43 : vector<1x128xf32> to vector<128xf32>
    %45 = vector.shape_cast %44 : vector<128xf32> to vector<1x1x128xf32>
    %46 = vector.broadcast %45 : vector<1x1x128xf32> to vector<8x16x128xf32>
    %47 = arith.mulf %42, %46 : vector<8x16x128xf32>
    %48 = arith.addf %41, %47 : vector<8x16x128xf32>
    %c1_33 = arith.constant 1 : index
    %c0_34 = arith.constant 0 : index
    %c0_35 = arith.constant 0 : index
    %49 = vector.load %arg12[%c1_33, %c0_34, %c0_35] : memref<10x24x128xf32, #tpu.memory_space<vmem>>, vector<8x16x128xf32>
    %50 = vector.extract_strided_slice %26 {offsets = [3, 0], sizes = [1, 128], strides = [1, 1]} : vector<9x128xf32> to vector<1x128xf32>
    %51 = vector.shape_cast %50 : vector<1x128xf32> to vector<128xf32>
    %52 = vector.shape_cast %51 : vector<128xf32> to vector<1x1x128xf32>
    %53 = vector.broadcast %52 : vector<1x1x128xf32> to vector<8x16x128xf32>
    %54 = arith.mulf %49, %53 : vector<8x16x128xf32>
    %55 = arith.addf %48, %54 : vector<8x16x128xf32>
    %c1_36 = arith.constant 1 : index
    %c1_37 = arith.constant 1 : index
    %c0_38 = arith.constant 0 : index
    %56 = vector.load %arg12[%c1_36, %c1_37, %c0_38] : memref<10x24x128xf32, #tpu.memory_space<vmem>>, vector<8x16x128xf32>
    %57 = vector.extract_strided_slice %26 {offsets = [4, 0], sizes = [1, 128], strides = [1, 1]} : vector<9x128xf32> to vector<1x128xf32>
    %58 = vector.shape_cast %57 : vector<1x128xf32> to vector<128xf32>
    %59 = vector.shape_cast %58 : vector<128xf32> to vector<1x1x128xf32>
    %60 = vector.broadcast %59 : vector<1x1x128xf32> to vector<8x16x128xf32>
    %61 = arith.mulf %56, %60 : vector<8x16x128xf32>
    %62 = arith.addf %55, %61 : vector<8x16x128xf32>
    %c1_39 = arith.constant 1 : index
    %c2_40 = arith.constant 2 : index
    %c0_41 = arith.constant 0 : index
    %63 = vector.load %arg12[%c1_39, %c2_40, %c0_41] : memref<10x24x128xf32, #tpu.memory_space<vmem>>, vector<8x16x128xf32>
    %64 = vector.extract_strided_slice %26 {offsets = [5, 0], sizes = [1, 128], strides = [1, 1]} : vector<9x128xf32> to vector<1x128xf32>
    %65 = vector.shape_cast %64 : vector<1x128xf32> to vector<128xf32>
    %66 = vector.shape_cast %65 : vector<128xf32> to vector<1x1x128xf32>
    %67 = vector.broadcast %66 : vector<1x1x128xf32> to vector<8x16x128xf32>
    %68 = arith.mulf %63, %67 : vector<8x16x128xf32>
    %69 = arith.addf %62, %68 : vector<8x16x128xf32>
    %c2_42 = arith.constant 2 : index
    %c0_43 = arith.constant 0 : index
    %c0_44 = arith.constant 0 : index
    %70 = vector.load %arg12[%c2_42, %c0_43, %c0_44] : memref<10x24x128xf32, #tpu.memory_space<vmem>>, vector<8x16x128xf32>
    %71 = vector.extract_strided_slice %26 {offsets = [6, 0], sizes = [1, 128], strides = [1, 1]} : vector<9x128xf32> to vector<1x128xf32>
    %72 = vector.shape_cast %71 : vector<1x128xf32> to vector<128xf32>
    %73 = vector.shape_cast %72 : vector<128xf32> to vector<1x1x128xf32>
    %74 = vector.broadcast %73 : vector<1x1x128xf32> to vector<8x16x128xf32>
    %75 = arith.mulf %70, %74 : vector<8x16x128xf32>
    %76 = arith.addf %69, %75 : vector<8x16x128xf32>
    %c2_45 = arith.constant 2 : index
    %c1_46 = arith.constant 1 : index
    %c0_47 = arith.constant 0 : index
    %77 = vector.load %arg12[%c2_45, %c1_46, %c0_47] : memref<10x24x128xf32, #tpu.memory_space<vmem>>, vector<8x16x128xf32>
    %78 = vector.extract_strided_slice %26 {offsets = [7, 0], sizes = [1, 128], strides = [1, 1]} : vector<9x128xf32> to vector<1x128xf32>
    %79 = vector.shape_cast %78 : vector<1x128xf32> to vector<128xf32>
    %80 = vector.shape_cast %79 : vector<128xf32> to vector<1x1x128xf32>
    %81 = vector.broadcast %80 : vector<1x1x128xf32> to vector<8x16x128xf32>
    %82 = arith.mulf %77, %81 : vector<8x16x128xf32>
    %83 = arith.addf %76, %82 : vector<8x16x128xf32>
    %c2_48 = arith.constant 2 : index
    %c2_49 = arith.constant 2 : index
    %c0_50 = arith.constant 0 : index
    %84 = vector.load %arg12[%c2_48, %c2_49, %c0_50] : memref<10x24x128xf32, #tpu.memory_space<vmem>>, vector<8x16x128xf32>
    %85 = vector.extract_strided_slice %26 {offsets = [8, 0], sizes = [1, 128], strides = [1, 1]} : vector<9x128xf32> to vector<1x128xf32>
    %86 = vector.shape_cast %85 : vector<1x128xf32> to vector<128xf32>
    %87 = vector.shape_cast %86 : vector<128xf32> to vector<1x1x128xf32>
    %88 = vector.broadcast %87 : vector<1x1x128xf32> to vector<8x16x128xf32>
    %89 = arith.mulf %84, %88 : vector<8x16x128xf32>
    %90 = arith.addf %83, %89 : vector<8x16x128xf32>
    %c0_51 = arith.constant 0 : index
    %c0_52 = arith.constant 0 : index
    %91 = vector.load %arg8[%c0_51, %c0_52] : memref<1x128xf32, #tpu.memory_space<vmem>>, vector<1x128xf32>
    %92 = vector.shape_cast %91 : vector<1x128xf32> to vector<1x1x128xf32>
    %93 = vector.broadcast %92 : vector<1x1x128xf32> to vector<8x16x128xf32>
    %94 = arith.addf %90, %93 : vector<8x16x128xf32>
    %cst_53 = arith.constant 5.000000e-01 : f32
    %95 = vector.broadcast %cst_53 : f32 to vector<8x16x128xf32>
    %96 = arith.mulf %95, %94 : vector<8x16x128xf32>
    %cst_54 = arith.constant 0.707106769 : f32
    %97 = vector.broadcast %cst_54 : f32 to vector<8x16x128xf32>
    %98 = arith.mulf %94, %97 : vector<8x16x128xf32>
    %99 = math.absf %98 : vector<8x16x128xf32>
    %cst_55 = arith.constant 0.327591091 : f32
    %100 = vector.broadcast %cst_55 : f32 to vector<8x16x128xf32>
    %101 = arith.mulf %100, %99 : vector<8x16x128xf32>
    %cst_56 = arith.constant 1.000000e+00 : f32
    %102 = vector.broadcast %cst_56 : f32 to vector<8x16x128xf32>
    %103 = arith.addf %102, %101 : vector<8x16x128xf32>
    %cst_57 = arith.constant 1.000000e+00 : f32
    %104 = vector.broadcast %cst_57 : f32 to vector<8x16x128xf32>
    %105 = arith.divf %104, %103 : vector<8x16x128xf32>
    %cst_58 = arith.constant 1.06140542 : f32
    %106 = vector.broadcast %cst_58 : f32 to vector<8x16x128xf32>
    %107 = arith.mulf %106, %105 : vector<8x16x128xf32>
    %cst_59 = arith.constant -1.45315206 : f32
    %108 = vector.broadcast %cst_59 : f32 to vector<8x16x128xf32>
    %109 = arith.addf %107, %108 : vector<8x16x128xf32>
    %110 = arith.mulf %109, %105 : vector<8x16x128xf32>
    %cst_60 = arith.constant 1.42141378 : f32
    %111 = vector.broadcast %cst_60 : f32 to vector<8x16x128xf32>
    %112 = arith.addf %110, %111 : vector<8x16x128xf32>
    %113 = arith.mulf %112, %105 : vector<8x16x128xf32>
    %cst_61 = arith.constant -0.284496725 : f32
    %114 = vector.broadcast %cst_61 : f32 to vector<8x16x128xf32>
    %115 = arith.addf %113, %114 : vector<8x16x128xf32>
    %116 = arith.mulf %115, %105 : vector<8x16x128xf32>
    %cst_62 = arith.constant 0.254829586 : f32
    %117 = vector.broadcast %cst_62 : f32 to vector<8x16x128xf32>
    %118 = arith.addf %116, %117 : vector<8x16x128xf32>
    %119 = arith.mulf %118, %105 : vector<8x16x128xf32>
    %120 = arith.mulf %99, %99 : vector<8x16x128xf32>
    %cst_63 = arith.constant 0.000000e+00 : f32
    %121 = vector.broadcast %cst_63 : f32 to vector<8x16x128xf32>
    %122 = arith.subf %121, %120 : vector<8x16x128xf32>
    %123 = math.exp %122 : vector<8x16x128xf32>
    %124 = arith.mulf %119, %123 : vector<8x16x128xf32>
    %cst_64 = arith.constant 1.000000e+00 : f32
    %125 = vector.broadcast %cst_64 : f32 to vector<8x16x128xf32>
    %126 = arith.subf %125, %124 : vector<8x16x128xf32>
    %cst_65 = arith.constant 0.000000e+00 : f32
    %127 = vector.broadcast %cst_65 : f32 to vector<8x16x128xf32>
    %128 = arith.cmpf oge, %98, %127 : vector<8x16x128xf32>
    %cst_66 = arith.constant 0.000000e+00 : f32
    %129 = vector.broadcast %cst_66 : f32 to vector<8x16x128xf32>
    %130 = arith.subf %129, %126 : vector<8x16x128xf32>
    %131 = arith.select %128, %126, %130 : vector<8x16x128xi1>, vector<8x16x128xf32>
    %cst_67 = arith.constant 1.000000e+00 : f32
    %132 = vector.broadcast %cst_67 : f32 to vector<8x16x128xf32>
    %133 = arith.addf %132, %131 : vector<8x16x128xf32>
    %134 = arith.mulf %96, %133 : vector<8x16x128xf32>
    %135 = vector.shape_cast %134 : vector<8x16x128xf32> to vector<128x128xf32>
    %c0_68 = arith.constant 0 : index
    %c0_69 = arith.constant 0 : index
    %136 = vector.load %arg9[%c0_68, %c0_69] : memref<128x128xf32, #tpu.memory_space<vmem>>, vector<128x128xf32>
    %cst_70 = arith.constant dense<0.000000e+00> : vector<128x128xf32>
    %137 = tpu.matmul %135, %136, %cst_70 {dimension_numbers = #tpu.dot_dimension_numbers<[1], [0], [0], [1], [0, 0, 1, 1], [], []>} : vector<128x128xf32>, vector<128x128xf32>, vector<128x128xf32> -> vector<128x128xf32>
    %c0_71 = arith.constant 0 : index
    %c0_72 = arith.constant 0 : index
    %138 = vector.load %arg10[%c0_71, %c0_72] : memref<1x128xf32, #tpu.memory_space<vmem>>, vector<1x128xf32>
    %139 = vector.broadcast %138 : vector<1x128xf32> to vector<128x128xf32>
    %140 = arith.addf %137, %139 : vector<128x128xf32>
    %c0_73 = arith.constant 0 : index
    %c0_74 = arith.constant 0 : index
    %c0_75 = arith.constant 0 : index
    %141 = vector.load %arg11[%c0_73, %c0_74, %c0_75] : memref<1x128x128xf32, #tpu.memory_space<vmem>>, vector<1x128x128xf32>
    %142 = vector.shape_cast %141 : vector<1x128x128xf32> to vector<128x128xf32>
    %143 = vector.shape_cast %140 : vector<128x128xf32> to vector<1x128x128xf32>
    tpu.vector_store %arg11[%c0_73, %c0_74, %c0_75], %143 {strides = array<i32>} : memref<1x128x128xf32, #tpu.memory_space<vmem>>, vector<1x128x128xf32>,
    return
  }
  func.func @transform_0(%arg0: i32, %arg1: i32) -> (i32, i32, i32, i32) {
    %c0_i32 = arith.constant 0 : i32
    %c0_i32_0 = arith.constant 0 : i32
    %c0_i32_1 = arith.constant 0 : i32
    return %arg0, %arg1, %c0_i32, %c0_i32_0 : i32, i32, i32, i32
  }
  func.func @transform_1(%arg0: i32, %arg1: i32) -> (i32, i32, i32, i32) {
    %c8_i32 = arith.constant 8 : i32
    %0 = arith.muli %arg1, %c8_i32 : i32
    %c1_i32 = arith.constant 1 : i32
    %1 = arith.subi %0, %c1_i32 : i32
    %c0_i32 = arith.constant 0 : i32
    %2 = arith.maxsi %1, %c0_i32 : i32
    %c0_i32_0 = arith.constant 0 : i32
    %c0_i32_1 = arith.constant 0 : i32
    %c0_i32_2 = arith.constant 0 : i32
    return %arg0, %2, %c0_i32_0, %c0_i32_1 : i32, i32, i32, i32
  }
  func.func @transform_2(%arg0: i32, %arg1: i32) -> (i32, i32, i32, i32) {
    %c8_i32 = arith.constant 8 : i32
    %0 = arith.muli %arg1, %c8_i32 : i32
    %c8_i32_0 = arith.constant 8 : i32
    %1 = arith.addi %0, %c8_i32_0 : i32
    %c15_i32 = arith.constant 15 : i32
    %2 = arith.minsi %1, %c15_i32 : i32
    %c0_i32 = arith.constant 0 : i32
    %c0_i32_1 = arith.constant 0 : i32
    %c0_i32_2 = arith.constant 0 : i32
    return %arg0, %2, %c0_i32, %c0_i32_1 : i32, i32, i32, i32
  }
  func.func @transform_3(%arg0: i32, %arg1: i32) -> (i32, i32) {
    %c0_i32 = arith.constant 0 : i32
    %c0_i32_0 = arith.constant 0 : i32
    %c0_i32_1 = arith.constant 0 : i32
    return %c0_i32, %c0_i32_0 : i32, i32
  }
  func.func @transform_4(%arg0: i32, %arg1: i32) -> (i32, i32) {
    %c0_i32 = arith.constant 0 : i32
    %c0_i32_0 = arith.constant 0 : i32
    %c0_i32_1 = arith.constant 0 : i32
    return %c0_i32, %c0_i32_0 : i32, i32
  }
  func.func @transform_5(%arg0: i32, %arg1: i32) -> (i32, i32) {
    %c0_i32 = arith.constant 0 : i32
    %c0_i32_0 = arith.constant 0 : i32
    %c0_i32_1 = arith.constant 0 : i32
    return %c0_i32, %c0_i32_0 : i32, i32
  }
  func.func @transform_6(%arg0: i32, %arg1: i32) -> (i32, i32) {
    %c0_i32 = arith.constant 0 : i32
    %c0_i32_0 = arith.constant 0 : i32
    %c0_i32_1 = arith.constant 0 : i32
    return %c0_i32, %c0_i32_0 : i32, i32
  }
  func.func @transform_7(%arg0: i32, %arg1: i32) -> (i32, i32) {
    %c0_i32 = arith.constant 0 : i32
    %c0_i32_0 = arith.constant 0 : i32
    %c0_i32_1 = arith.constant 0 : i32
    return %c0_i32, %c0_i32_0 : i32, i32
  }
  func.func @transform_8(%arg0: i32, %arg1: i32) -> (i32, i32) {
    %c0_i32 = arith.constant 0 : i32
    %c0_i32_0 = arith.constant 0 : i32
    %c0_i32_1 = arith.constant 0 : i32
    return %c0_i32, %c0_i32_0 : i32, i32
  }
  func.func @transform_9(%arg0: i32, %arg1: i32) -> (i32, i32, i32) {
    %c0_i32 = arith.constant 0 : i32
    %c0_i32_0 = arith.constant 0 : i32
    return %arg0, %arg1, %c0_i32 : i32, i32, i32
  }
}

</mosaic_0001>

<bundles_post_ra>
// kernel: tpu_custom_call.1
= control target key start
LH: loop header
LB: loop body
LE: loop exit
PB: predicated region body
PF: predicated region fallthrough
CT: control target
= control target key end

     0   :  { %s4589_s0 = inlined_call_operand.hbm [shape: f32[2,16,16,64], index: 0, kind: input, shape index: {}]   ;;  %s4590_s1 = inlined_call_operand.hbm [shape: f32[2,16,16,64], index: 1, kind: input, shape index: {}]   ;;  %s4591_s2 = inlined_call_operand.hbm [shape: f32[2,16,16,64], index: 2, kind: input, shape index: {}]   ;;  %s4592_s3 = inlined_call_operand.hbm [shape: f32[64,128], index: 3, kind: input, shape index: {}]   ;;  %s4593_s4 = inlined_call_operand.vmem [shape: f32[1,128], index: 4, kind: input, shape index: {}]   ;;  %s4594_s5 = inlined_call_operand.vmem [shape: f32[9,128], index: 5, kind: input, shape index: {}]   ;;  %s4595_s6 = inlined_call_operand.vmem [shape: f32[1,128], index: 6, kind: input, shape index: {}]   ;;  %s4596_s7 = inlined_call_operand.hbm [shape: f32[128,128], index: 7, kind: input, shape index: {}]   ;;  %s4597_s8 = inlined_call_operand.vmem [shape: f32[1,128], index: 8, kind: input, shape index: {}]   ;;  %s4598_s9 = inlined_call_operand.hbm [shape: f32[2,256,128], index: 9, kind: output, shape index: {}]  }
   0x1   :  { %4648 = sst [smem:[#allocation48_spill]] %s4589_s0 }
   0x2   :  { %4649 = sst [smem:[#allocation49_spill]] %s4590_s1 }
   0x3   :  { %4650 = sst [smem:[#allocation50_spill]] %s4591_s2 }
   0x4   :  { %4651 = sst [smem:[#allocation51_spill]] %s4592_s3 }
   0x5   :  { %4652 = sst [smem:[#allocation52_spill]] %s4593_s4 }
   0x6   :  { %4653 = sst [smem:[#allocation53_spill]] %s4594_s5 }
   0x7   :  { %4654 = sst [smem:[#allocation54_spill]] %s4595_s6 }
   0x8   :  { %4655 = sst [smem:[#allocation55_spill]] %s4596_s7 }
   0x9   :  { %4656 = sst [smem:[#allocation56_spill]] %s4597_s8 }
   0xa   :  { %4657 = sst [smem:[#allocation57_spill]] %s4598_s9 }
   0xb   :  { %14 = vsyncpa [#allocation4], 0 }
   0xc   :  { %16 = vsyncpa [#allocation4 + $0x1], 0 }
   0xd   :  { %17 = vsyncpa [#allocation7], 0 }
   0xe   :  { %19 = vsyncpa [#allocation7 + $0x1], 0 }
   0xf   :  { %20 = vsyncpa [#allocation10], 0 }
  0x10   :  { %21 = vsyncpa [#allocation5], 0 }
  0x11   :  { %23 = vsyncpa [#allocation5 + $0x1], 0  ;;  %s3239_s30 = smov 0   ;;  %s3241_s10 = smov 0  }
  0x12   :  { %s3243_s11 = smov 0   ;;  %s3245_s12 = smov 0  }
  0x13   :  { %s3247_s13 = smov 0   ;;  %s3249_s14 = smov 0  }
  0x14   :  { %s3251_s15 = smov 0   ;;  %s3253_s16 = smov 0  }
  0x15   :  { %s3255_s17 = smov 0   ;;  %s3257_s18 = smov 0  }
  0x16   :  { %s3259_s19 = smov 0   ;;  %s3261_s20 = smov 0  }
  0x17   :  { %s3263_s21 = smov 0   ;;  %s3265_s22 = smov 0  }
  0x18 LB: > { %4658 = sst [smem:[#allocation18_spill]] %s3122_s30  ;;  %s3310_s23 = sadd.s32 4294967295, %s3174_s22   ;;  %s3174_s22 = sphi %s3265_s22, %s29_s22   ;;  %s3170_s21 = sphi %s3263_s21, %s4773_s21   ;;  %s3166_s20 = sphi %s3261_s20, %s4772_s20   ;;  %s3162_s19 = sphi %s3259_s19, %s4783_s19   ;;  %s3158_s18 = sphi %s3257_s18, %s4782_s18   ;;  %s3154_s17 = sphi %s3255_s17, %s4781_s17   ;;  %s3150_s16 = sphi %s3253_s16, %s4780_s16   ;;  %s3146_s15 = sphi %s3251_s15, %s4779_s15   ;;  %s3142_s14 = sphi %s3249_s14, %s4778_s14   ;;  %s3138_s13 = sphi %s3247_s13, %s4777_s13   ;;  %s3134_s12 = sphi %s3245_s12, %s4776_s12   ;;  %s3130_s11 = sphi %s3243_s11, %s4775_s11   ;;  %s3126_s10 = sphi %s3241_s10, %s4767_s10   ;;  %s3122_s30 = sphi %s3239_s30, %s4766_s30  }
  0x19   : > { %4659 = sst [smem:[#allocation19_spill]] %s3126_s10  ;;  %p2264_p0 = scmp.ge.s32.totalorder %s3174_s22, 1 }
  0x1a   : > { %4660 = sst [smem:[#allocation20_spill]] %s3130_s11  ;;  %p4601_p1 = scmp.eq.s32.totalorder %s3310_s23, 0 }
  0x1b   : > { %4661 = sst [smem:[#allocation21_spill]] %s3138_s13  ;;  %p300_p3 = scmp.lt.s32.totalorder %s3174_s22, 5 }
  0x1c   : > { %4662 = sst [smem:[#allocation22_spill]] %s3158_s18  ;;  %s3176_s25 = smov [#allocation9]  }
  0x1d   : > { %4663 = sst [smem:[#allocation23_spill]] %s3162_s19  ;;  %p3316_p4 = pnand %p2264_p0, %p300_p3 }
  0x1e   : > { %4664 = sst [smem:[#allocation24_spill]] %s3166_s20  ;;  %s312_s26 = sshll.u32 %s3176_s25, 4  ;;  %s313_s26 = int_to_ptr.vmem [resolvable:$true] %s312_s26 }
  0x1f   : > { %4665 = sst [smem:[#allocation25_spill]] %s3170_s21  ;;  %p2656_p5 = pneg %p3316_p4 }
  0x20   : > { %s4666_s24 = scalar_select %p3316_p4, 1, 0 }
  0x21   : > { %p3324_p6 = pnand %p2656_p5, %p4601_p1  ;;  %s4669_s3 = sld [smem:[#allocation51_spill]] }
  0x22   : > { %4667 = sst [smem:[#allocation26_spill]] %s4666_s24 }
  0x23   : > { %p4620_p8 = pneg %p3324_p6 }
  0x27   : > { %s2870_s9 = scalar_lea.hbm %s4669_s3, 1024 }
  0x28   : > { %p2871_p7 = scmp.ne.s32.totalorder %s4669_s3, %s2870_s9  ;;  %p2877_p11 = scmp.lt.u32.totalorder %s2870_s9, %s4669_s3 }
  0x2a   : > { %p2873_p9 = pnand %p4620_p8, %p2871_p7 }
  0x2c   : > { %p2874_p10 = pneg %p2873_p9 }
  0x2e   : > { %p2879_p12 = pnand %p2877_p11, %p2874_p10 }
  0x30   : > { %2882 = shalt.err (!%p2879_p12)
}
  0x31   : > { %s2883_s28 = scalar_lea.vmem %s313_s26, 1024  ;;  %p2891_p5 = scmp.lt.s32.totalorder %s313_s26, %s313_s26 }
  0x32   : > { %p2884_p13 = scmp.ne.s32.totalorder %s313_s26, %s2883_s28  ;;  %p2892_p2 = scmp.lt.s32.totalorder %s2883_s28, %s2883_s28 }
  0x34   : > { %p2886_p0 = pnand %p2884_p13, %p4620_p8  ;;  %p2893_p1 = por %p2892_p2, %p2891_p5 }
  0x36   : > { %p2887_p3 = pneg %p2886_p0 }
  0x38   : > { %p2894_p4 = pnand %p2893_p1, %p2887_p3 }
  0x3a   : > { %2897 = shalt.err (!%p2894_p4)
}
  0x3b   : > { %s4604_s8 = smov 128   ;;  %s4606_s6 = smov 8  }
  0x3c   : > { %2659 = dma.hbm_to_vmem [thread:$0]  (!%p3324_p6), %s4669_s3, 1024, %s313_s26, [#allocation10], %s4604_s8, %s4604_s8, %s4606_s6  }
  0x3d   : > { %s38_s29 = sadd.s32 1, %s3166_s20  ;;  %s41_s25 = sadd.s32 1, %s3170_s21 }
  0x3e   : > { %p39_p1 = scmp.ge.s32.totalorder %s38_s29, 2  ;;  %p4619_p2 = scmp.eq.s32.totalorder %s3174_s22, 0 }
  0x3f   : > { %s2258_s28 = sshll.u32 %s3166_s20, 3  ;;  %s86_s5 = sadd.s32 1, %s3142_s14 }
  0x40   : > { %s4785_s29 = smov (%p39_p1, %s38_s29), 0  ;;  %s4787_s25 = smov (!%p39_p1, %s41_s25), %s3170_s21 }
  0x41   : > { %4670 = sst [smem:[#allocation27_spill]] %s4785_s29  ;;  %s46_s18 = ssub.s32 %s3166_s20, %s4785_s29 }
  0x42   : > { %s2259_s4 = sadd.s32 4294967295, %s2258_s28  ;;  %p43_p4 = scmp.ge.s32.totalorder %s4787_s25, 2 }
  0x43   : > { %p75_p7 = scmp.gt.s32.totalorder %s2259_s4, 0  ;;  %s2260_s26 = sshll.u32 %s4785_s29, 3 }
  0x44   : > { %p93_p9 = scmp.ne.s32.totalorder %s3142_s14, %s3138_s13  ;;  %s4789_s25 = smov (%p43_p4, %s4787_s25), 0 }
  0x45   : > { %4671 = sst [smem:[#allocation28_spill]] %s4789_s25  ;;  %s4791_s4 = smov (!%p75_p7, %s2259_s4), 0 }
  0x46   : > { %s3370_s9 = ssub.s32 %s3170_s21, %s4789_s25  ;;  %s2261_s19 = sadd.s32 4294967295, %s2260_s26 }
  0x47   : > { %4672 = sst [smem:[#allocation29_spill]] %s3370_s9  ;;  %s3373_s8 = sor.u32 %s46_s18, %s3370_s9 }
  0x48   : > { %p79_p10 = scmp.gt.s32.totalorder %s2261_s19, 0  ;;  %p3378_p12 = por %p93_p9, %p4619_p2 }
  0x49   : > { %p99_p13 = scmp.ne.s32.totalorder %s3138_s13, %s3134_s12  ;;  %s3384_s3 = sadd.s32 8, %s2258_s28 }
  0x4a   : > { %s4793_s19 = smov (!%p79_p10, %s2261_s19), 0  ;;  %p4674_p3 = scmp.eq.s32.totalorder %s3310_s23, 0 }
  0x4b   : > { %s82_s25 = ssub.s32 %s4791_s4, %s4793_s19  ;;  %s3394_s24 = sadd.s32 8, %s2260_s26 }
  0x4c   : > { %s83_s18 = sor.u32 %s82_s25, %s3370_s9  ;;  %p3390_p5 = por %p99_p13, %p4674_p3 }
  0x4d   : > { %p84_p1 = scmp.eq.s32.totalorder %s83_s18, 0  ;;  %p4618_p7 = scmp.lt.s32.totalorder %s3174_s22, 4 }
  0x4e   : > { %s4675_s29 = scalar_select %p3390_p5, 1, 0 }
  0x4f   : > { %s3399_s12 = scalar_select %p84_p1, %s3142_s14, %s86_s5  }
  0x50   : > { %4676 = sst [smem:[#allocation30_spill]] %s4675_s29  ;;  %s3402_s28 = sshll.u32 %s3170_s21, 5 }
  0x51   : > { %s375_s19 = sand.u32 1, %s3174_s22   ;;  %s377_s25 = sand.u32 1, %s3142_s14  }
  0x52   : > { %s2273_s13 = sshll.u32 %s377_s25, 4  ;;  %s2276_s2 = sshll.u32 %s4791_s4, 1 }
  0x53   : > { %s389_s9 = sadd.s32 %s2276_s2, %s3402_s28  ;;  %s379_s29 = scalar_lea.vmem [#allocation6], %s2273_s13 }
  0x54   : > { %s2278_s30 = sshll.u32 %s389_s9, 7  ;;  %s392_s18 = sshll.u32 %s379_s29, 4  ;;  %s3412_s18 = int_to_ptr.vmem [resolvable:$true] %s392_s18 }
  0x55   : > { %s4677_s1 = sld [smem:[#allocation49_spill]]  ;;  %p3418_p9 = pnand %p4618_p7, %p3378_p12 }
  0x56   : > { %s3179_s2 = smov [#allocation11]  }
  0x57   : > { %s334_s4 = sshll.u32 %s3179_s2, 4  ;;  %p2900_p13 = pneg %p3418_p9  ;;  %s3422_s4 = int_to_ptr.vmem [resolvable:$true] %s334_s4 }
  0x5b   : > { %s3410_s26 = scalar_lea.hbm %s4677_s1, %s2278_s30  ;;  %s3424_s30 = scalar_lea.sflag [#allocation7], %s375_s19 }
  0x5c   : > { %s2898_s10 = scalar_lea.hbm %s3410_s26, 256  ;;  %s2903_s6 = scalar_lea.hbm %s4677_s1, 8192 }
  0x5d   : > { %p2899_p10 = scmp.ne.s32.totalorder %s3410_s26, %s2898_s10  ;;  %p2904_p12 = scmp.lt.u32.totalorder %s3410_s26, %s4677_s1 }
  0x5e   : > { %p2905_p4 = scmp.lt.u32.totalorder %s2903_s6, %s2898_s10  ;;  %p2907_p7 = scmp.lt.u32.totalorder %s2898_s10, %s3410_s26 }
  0x5f   : > { %p2901_p3 = pnand %p2900_p13, %p2899_p10 }
  0x60   : > { %p2906_p0 = por %p2905_p4, %p2904_p12 }
  0x61   : > { %p2902_p1 = pneg %p2901_p3 }
  0x62   : > { %p2908_p2 = por %p2907_p7, %p2906_p0 }
  0x64   : > { %p2909_p11 = pnand %p2908_p2, %p2902_p1 }
  0x66   : > { %2912 = shalt.err (!%p2909_p11)
}
  0x67   : > { %s2913_s19 = scalar_lea.vmem %s3412_s18, 256  ;;  %s3180_s25 = smov [#allocation6]  }
  0x68   : > { %p2914_p10 = scmp.ne.s32.totalorder %s3412_s18, %s2913_s19  ;;  %s2918_s2 = sshll.u32 %s3180_s25, 4  ;;  %s2919_s2 = int_to_ptr.vmem [resolvable:$false] %s2918_s2 }
  0x69   : > { %s2920_s11 = scalar_lea.vmem %s2919_s2, 512  ;;  %p2921_p5 = scmp.lt.s32.totalorder %s3412_s18, %s2919_s2 }
  0x6a   : > { %p2916_p3 = pnand %p2914_p10, %p2900_p13  ;;  %p2922_p4 = scmp.lt.s32.totalorder %s2920_s11, %s2913_s19 }
  0x6c   : > { %p2917_p8 = pneg %p2916_p3  ;;  %p2923_p12 = por %p2922_p4, %p2921_p5 }
  0x6e   : > { %p2924_p0 = pnand %p2923_p12, %p2917_p8 }
  0x70   : > { %2927 = shalt.err (!%p2924_p0)
}
  0x71   : > { %s4679_s10 = smov 8   ;;  %s4680_s13 = smov 128  }
  0x72   : > { %2669 = dma.hbm_to_vmem [thread:$0]  (!%p3418_p9), %s3410_s26, 256, %s3412_s18, %s3424_s30, %s4680_s13, %s4680_s13, %s4679_s10  }
  0x73   : > { %s4681_s7 = sld [smem:[#allocation55_spill]]  ;;  %p4682_p8 = pneg %p3324_p6 }
  0x79   : > { %s2928_s9 = scalar_lea.hbm %s4681_s7, 2048 }
  0x7a   : > { %p2929_p2 = scmp.ne.s32.totalorder %s4681_s7, %s2928_s9  ;;  %p2935_p7 = scmp.lt.u32.totalorder %s2928_s9, %s4681_s7 }
  0x7c   : > { %p2931_p11 = pnand %p2929_p2, %p4682_p8 }
  0x7e   : > { %p2932_p5 = pneg %p2931_p11 }
  0x80   : > { %p2937_p13 = pnand %p2935_p7, %p2932_p5 }
  0x82   : > { %2940 = shalt.err (!%p2937_p13)
}
  0x83   : > { %s2941_s18 = scalar_lea.vmem %s3422_s4, 2048  ;;  %p4683_p1 = pmov %p4682_p8 }
  0x84   : > { %p2942_p9 = scmp.ne.s32.totalorder %s3422_s4, %s2941_s18  ;;  %p2949_p4 = scmp.lt.s32.totalorder %s3422_s4, %s3422_s4 }
  0x85   : > { %p2950_p12 = scmp.lt.s32.totalorder %s2941_s18, %s2941_s18 }
  0x86   : > { %p2944_p10 = pnand %p2942_p9, %p4683_p1 }
  0x87   : > { %p2951_p0 = por %p2950_p12, %p2949_p4 }
  0x88   : > { %p2945_p3 = pneg %p2944_p10 }
  0x8a   : > { %p2952_p2 = pnand %p2951_p0, %p2945_p3 }
  0x8c   : > { %2955 = shalt.err (!%p2952_p2)
}
  0x8d   : > { %2662 = dma.hbm_to_vmem [thread:$0]  (!%p3324_p6), %s4681_s7, 2048, %s3422_s4, [#allocation10], %s4680_s13, %s4680_s13, %s4679_s10  }
  0x8e   : > { %s2257_s27 = sadd.s32 4294967294, %s3174_s22   ;;  %s50_s6 = sadd.s32 1, %s3154_s17 }
  0x8f   : > { %p57_p8 = scmp.ne.s32.totalorder %s3154_s17, %s3150_s16  ;;  %p4684_p11 = scmp.eq.s32.totalorder %s3373_s8, 0 }
  0x90   : > { %p4685_p5 = scmp.eq.s32.totalorder %s3174_s22, 0  ;;  %p63_p13 = scmp.ne.s32.totalorder %s3150_s16, %s3146_s15 }
  0x91   : > { %s3490_s29 = scalar_select %p4684_p11, %s3154_s17, %s50_s6  }
  0x92   : > { %p3494_p7 = por %p4685_p5, %p57_p8  ;;  %p4687_p9 = scmp.eq.s32.totalorder %s3310_s23, 3 }
  0x93   : > { %p293_p6 = scmp.eq.s32.totalorder %s2257_s27, 3  ;;  %p4689_p10 = scmp.eq.s32.totalorder %s3310_s23, 0 }
  0x94   : > { %p3502_p1 = por %p4687_p9, %p57_p8  ;;  %s351_s8 = sand.u32 1, %s3154_s17  }
  0x95   : > { %p3508_p3 = por %p4689_p10, %p63_p13  ;;  %p3513_p4 = por %p293_p6, %p63_p13 }
  0x96   : > { %s4688_s25 = scalar_select %p3502_p1, 1, 0 }
  0x97   : > { %s4691_s2 = scalar_select %p3513_p4, 1, 0 }
  0x98   : > { %s2268_s5 = sshll.u32 %s351_s8, 7  ;;  %s2325_s19 = sshll.u32 %s3166_s20, 4 }
  0x99   : > { %s362_s18 = sadd.s32 %s2325_s19, %s3402_s28  ;;  %s355_s11 = scalar_lea.vmem [#allocation3], %s2268_s5 }
  0x9a   : > { %s2272_s26 = sshll.u32 %s362_s18, 7  ;;  %s365_s6 = sshll.u32 %s355_s11, 4  ;;  %s3524_s6 = int_to_ptr.vmem [resolvable:$true] %s365_s6 }
  0x9b   : > { %s4692_s0 = sld [smem:[#allocation48_spill]]  ;;  %p4693_p12 = scmp.lt.s32.totalorder %s3174_s22, 4 }
  0x9c   : > { %s3534_s5 = scalar_lea.sflag [#allocation4], %s351_s8 }
  0x9d   : > { %p3530_p0 = pnand %p4693_p12, %p3494_p7 }
  0x9f   : > { %p2958_p8 = pneg %p3530_p0 }
  0xa1   : > { %s3522_s27 = scalar_lea.hbm %s4692_s0, %s2272_s26  ;;  %s2961_s9 = scalar_lea.hbm %s4692_s0, 8192 }
  0xa2   : > { %s2956_s19 = scalar_lea.hbm %s3522_s27, 2048  ;;  %p2962_p7 = scmp.lt.u32.totalorder %s3522_s27, %s4692_s0 }
  0xa3   : > { %p2957_p2 = scmp.ne.s32.totalorder %s3522_s27, %s2956_s19  ;;  %p2963_p13 = scmp.lt.u32.totalorder %s2961_s9, %s2956_s19 }
  0xa4   : > { %p2965_p6 = scmp.lt.u32.totalorder %s2956_s19, %s3522_s27 }
  0xa5   : > { %p2959_p11 = pnand %p2958_p8, %p2957_p2  ;;  %p2964_p9 = por %p2963_p13, %p2962_p7 }
  0xa7   : > { %p2960_p5 = pneg %p2959_p11  ;;  %p2966_p10 = por %p2965_p6, %p2964_p9 }
  0xa9   : > { %p2967_p12 = pnand %p2966_p10, %p2960_p5 }
  0xab   : > { %2970 = shalt.err (!%p2967_p12)
}
  0xac   : > { %s2971_s8 = scalar_lea.vmem %s3524_s6, 2048  ;;  %s3181_s11 = smov [#allocation3]  }
  0xad   : > { %p2972_p2 = scmp.ne.s32.totalorder %s3524_s6, %s2971_s8  ;;  %s2976_s1 = sshll.u32 %s3181_s11, 4  ;;  %s2977_s1 = int_to_ptr.vmem [resolvable:$false] %s2976_s1 }
  0xae   : > { %s2978_s7 = scalar_lea.vmem %s2977_s1, 4096  ;;  %p2979_p1 = scmp.lt.s32.totalorder %s3524_s6, %s2977_s1 }
  0xaf   : > { %p2974_p11 = pnand %p2972_p2, %p2958_p8  ;;  %p2980_p7 = scmp.lt.s32.totalorder %s2978_s7, %s2971_s8 }
  0xb1   : > { %p2975_p4 = pneg %p2974_p11  ;;  %p2981_p13 = por %p2980_p7, %p2979_p1 }
  0xb3   : > { %p2982_p9 = pnand %p2981_p13, %p2975_p4 }
  0xb5   : > { %2985 = shalt.err (!%p2982_p9)
}
  0xb6   : > { %s4695_s19 = sld [smem:[#allocation20_spill]]  ;;  %s4696_s9 = sld [smem:[#allocation19_spill]] }
  0xb7   : > { %s4697_s18 = sld [smem:[#allocation18_spill]]  ;;  %s4698_s26 = sld [smem:[#allocation29_spill]] }
  0xb8   : > { %2666 = dma.hbm_to_vmem [thread:$0]  (!%p3530_p0), %s3522_s27, 2048, %s3524_s6, %s3534_s5, %s4680_s13, %s4680_s13, %s4679_s10  }
  0xb9   : > { %p4699_p1 = scmp.lt.s32.totalorder %s3384_s3, 15  ;;  %p4700_p4 = scmp.lt.s32.totalorder %s3394_s24, 15 }
  0xba   : > { %p4701_p6 = scmp.eq.s32.totalorder %s3174_s22, 0  ;;  %p4703_p2 = scmp.eq.s32.totalorder %s3310_s23, 0 }
  0xbb   : > { %s4795_s3 = smov (!%p4699_p1, %s3384_s3), 15  ;;  %s4797_s24 = smov (!%p4700_p4, %s3394_s24), 15 }
  0xbc   : > { %s122_s21 = sadd.s32 1, %s4695_s19  ;;  %p129_p8 = scmp.ne.s32.totalorder %s4695_s19, %s4696_s9 }
  0xbd   : > { %s118_s8 = ssub.s32 %s4795_s3, %s4797_s24  ;;  %p135_p5 = scmp.ne.s32.totalorder %s4696_s9, %s4697_s18 }
  0xbe   : > { %s119_s11 = sor.u32 %s118_s8, %s4698_s26  ;;  %p3579_p10 = por %p129_p8, %p4701_p6 }
  0xbf   : > { %p120_p12 = scmp.eq.s32.totalorder %s119_s11, 0  ;;  %p3585_p11 = por %p135_p5, %p4703_p2 }
  0xc0   : > { %s404_s27 = sand.u32 1, %s4695_s19   ;;  %s2281_s5 = sshll.u32 %s4795_s3, 1 }
  0xc1   : > { %s4704_s6 = scalar_select %p3585_p11, 1, 0 }
  0xc2   : > { %s4799_s19 = smov (!%p120_p12, %s4695_s19), %s122_s21  ;;  %s2279_s24 = sshll.u32 %s404_s27, 4 }
  0xc3   : > { %s416_s7 = sadd.s32 %s2281_s5, %s3402_s28  ;;  %s4705_s8 = sld [smem:[#allocation50_spill]] }
  0xc4   : > { %s2283_s9 = sshll.u32 %s416_s7, 7  ;;  %s406_s11 = scalar_lea.vmem [#allocation8], %s2279_s24 }
  0xc5   : > { %s419_s20 = sshll.u32 %s406_s11, 4  ;;  %p4706_p0 = scmp.lt.s32.totalorder %s3174_s22, 4  ;;  %s3599_s20 = int_to_ptr.vmem [resolvable:$true] %s419_s20 }
  0xc7   : > { %p3605_p7 = pnand %p4706_p0, %p3579_p10 }
  0xc9   : > { %s3597_s0 = scalar_lea.hbm %s4705_s8, %s2283_s9  ;;  %p2988_p9 = pneg %p3605_p7 }
  0xca   : > { %s2986_s28 = scalar_lea.hbm %s3597_s0, 256  ;;  %s2991_s5 = scalar_lea.hbm %s4705_s8, 8192 }
  0xcb   : > { %p2987_p13 = scmp.ne.s32.totalorder %s3597_s0, %s2986_s28  ;;  %p2992_p8 = scmp.lt.u32.totalorder %s3597_s0, %s4705_s8 }
  0xcc   : > { %p2993_p5 = scmp.lt.u32.totalorder %s2991_s5, %s2986_s28  ;;  %p2995_p10 = scmp.lt.u32.totalorder %s2986_s28, %s3597_s0 }
  0xcd   : > { %p2989_p1 = pnand %p2988_p9, %p2987_p13 }
  0xce   : > { %p2994_p6 = por %p2993_p5, %p2992_p8 }
  0xcf   : > { %p2990_p4 = pneg %p2989_p1 }
  0xd0   : > { %p2996_p12 = por %p2995_p10, %p2994_p6 }
  0xd2   : > { %p2997_p2 = pnand %p2996_p12, %p2990_p4 }
  0xd4   : > { %3000 = shalt.err (!%p2997_p2)
}
  0xd5   : > { %s3001_s7 = scalar_lea.vmem %s3599_s20, 256  ;;  %s3182_s9 = smov [#allocation8]  }
  0xd6   : > { %p3002_p0 = scmp.ne.s32.totalorder %s3599_s20, %s3001_s7  ;;  %s3006_s18 = sshll.u32 %s3182_s9, 4  ;;  %s3007_s18 = int_to_ptr.vmem [resolvable:$false] %s3006_s18 }
  0xd7   : > { %s3008_s26 = scalar_lea.vmem %s3007_s18, 512  ;;  %p3009_p11 = scmp.lt.s32.totalorder %s3599_s20, %s3007_s18 }
  0xd8   : > { %p3004_p13 = pnand %p3002_p0, %p2988_p9  ;;  %p3010_p8 = scmp.lt.s32.totalorder %s3008_s26, %s3001_s7 }
  0xda   : > { %p3005_p1 = pneg %p3004_p13  ;;  %p3011_p5 = por %p3010_p8, %p3009_p11 }
  0xdc   : > { %p3012_p6 = pnand %p3011_p5, %p3005_p1 }
  0xde   : > { %3015 = shalt.err (!%p3012_p6)
}
  0xdf   : > { %2672 = dma.hbm_to_vmem [thread:$0]  (!%p3605_p7), %s3597_s0, 256, %s3599_s20, %s3424_s30, %s4680_s13, %s4680_s13, %s4679_s10  }
  0xe0   : > { %s4708_s11 = sld [smem:[#allocation26_spill]] }
  0xe6   : > { %p4709_p9 = scmp.ne.s32.totalorder %s4708_s11, 0 }
  0xe8   : > { %431 = sbr.rel (%p4709_p9) target bundleno = 1459 (0x5b3), region = 56 }
  0xef   : > { %s3641_s28 = sand.u32 1, %s3150_s16  }
  0xf0   : > { %s2285_s21 = sshll.u32 %s3641_s28, 7  ;;  %s434_s27 = scalar_lea.sflag [#allocation4], %s3641_s28 }
  0xf1   : > { %s3647_s3 = scalar_lea.vmem [#allocation3], %s2285_s21 }
  0xf2   : > { %3101 = dma.done.wait (%p3508_p3), %s434_s27, 2048  }
  0xf3   : > { %3103 = vsyncadd (%p3508_p3), %s434_s27, 4294965248  ;;  %s4710_s0 = sld [smem:[#allocation21_spill]]  ;;  %s4711_s20 = sld [smem:[#allocation30_spill]] }
  0xf4   : > { %s442_s30 = sand.u32 1, %s3310_s23  }
  0xf5   : > { %s443_s5 = scalar_lea.sflag [#allocation7], %s442_s30 }
  0xf9   : > { %s444_s10 = sand.u32 1, %s4710_s0   ;;  %p4712_p11 = scmp.ne.s32.totalorder %s4711_s20, 0 }
  0xfa   : > { %s3655_s13 = sshll.u32 %s444_s10, 4 }
  0xfb   : > { %s446_s1 = scalar_lea.vmem [#allocation6], %s3655_s13 }
  0xfc   : > { %3105 = dma.done.wait (%p4712_p11), %s443_s5, 256  }
  0xfd   : > { %3107 = vsyncadd (%p4712_p11), %s443_s5, 4294967040  ;;  %s4713_s24 = sld [smem:[#allocation19_spill]]  ;;  %p4714_p3 = scmp.ne.s32.totalorder %s4704_s6, 0 }
 0x103   : > { %s453_s7 = sand.u32 1, %s4713_s24  }
 0x104   : > { %s3663_s4 = sshll.u32 %s453_s7, 4 }
 0x105   : > { %s455_s9 = scalar_lea.vmem [#allocation8], %s3663_s4 }
 0x106   : > { %3109 = dma.done.wait (%p4714_p3), %s443_s5, 256  }
 0x107   : > { %3111 = vsyncadd (%p4714_p3), %s443_s5, 4294967040  ;;  %p4715_p7 = scmp.eq.s32.totalorder %s3310_s23, 0 }
 0x109   : > { %3113 = dma.done.wait (%p4715_p7), [#allocation10], 3072   ;;  %p4716_p4 = pmov %p4715_p7 }
 0x10a   : > { %v3183_v0 = vmov 0.0   ;;  %v518_v1 = vld [vmem:[#allocation9] sm:$0xff]  ;;  %v519_v2 = vld [vmem:[#allocation9 + $0x8] sm:$0xff]  ;;  %v520_v3 = vld [vmem:[#allocation9 + $0x10] sm:$0xff]  ;;  %vm549_vm0 = vcmask 523264   ;;  %s4717_s18 = sld [smem:[#allocation52_spill]] }
 0x10b   : > { %3115 = vsyncadd (%p4716_p4), [#allocation10], 4294964224  ;;  %743 = vst [vmem:[#allocation2] sm:$0x1] %v3183_v0  ;;  %v3674_v4 = vpack.c.bf16 %v519_v2, %v518_v1  ;;  %v521_v5 = vld [vmem:[#allocation9 + $0x18] sm:$0xff]  ;;  %v522_v7 = vld [vmem:[#allocation9 + $0x20] sm:$0xff] }
 0x10c   : > { %744 = vst [vmem:[#allocation2 + $0x18] sm:$0x1] %v3183_v0  ;;  %745 = vst [vmem:[#allocation2 + $0x30] sm:$0x1] %v3183_v0  ;;  %v3676_v6 = vpack.c.bf16 %v521_v5, %v520_v3  ;;  %v523_v8 = vld [vmem:[#allocation9 + $0x28] sm:$0xff]  ;;  %v527_v9 = vld [vmem:[%s3647_s3] sm:$0xff] }
 0x10d   : > { %746 = vst [vmem:[#allocation2 + $0x48] sm:$0x1] %v3183_v0  ;;  %747 = vst [vmem:[#allocation2 + $0x60] sm:$0x1] %v3183_v0  ;;  %2537 = vmatprep.subr.bf16.mxu0 %v3674_v4  ;;  %2616 = vmatprep.subr.bf16.mxu1 %v3674_v4  ;;  %v535_v10 = vld [vmem:[%s3647_s3 + $0x40] sm:$0xff]  ;;  %v3686_v11 = vpack.c.bf16 %v523_v8, %v522_v7  ;;  %v524_v12 = vld [vmem:[#allocation9 + $0x30] sm:$0xff] }
 0x10e   : > { %748 = vst [vmem:[#allocation2 + $0x78] sm:$0x1] %v3183_v0  ;;  %749 = vst [vmem:[#allocation2 + $0x90] sm:$0x1] %v3183_v0  ;;  %2539 = vmatpush3.bf16.msra.mxu0 %v3674_v4  ;;  %2620 = vmatpush3.bf16.msra.mxu1 %v3674_v4  ;;  %v525_v13 = vld [vmem:[#allocation9 + $0x38] sm:$0xff]  ;;  %v528_v15 = vld [vmem:[%s3647_s3 + $0x8] sm:$0xff] }
 0x10f   : > { %750 = vst [vmem:[#allocation2 + $0xa8] sm:$0x1] %v3183_v0  ;;  %751 = vst [vmem:[#allocation2 + $0xc0] sm:$0x1] %v3183_v0  ;;  %2541 = vmatprep.subr.bf16.mxu0 %v3676_v6  ;;  %2617 = vmatprep.subr.bf16.mxu1 %v3676_v6  ;;  %v3694_v14 = vpack.c.bf16 %v525_v13, %v524_v12  ;;  %v536_v16 = vld [vmem:[%s3647_s3 + $0x48] sm:$0xff]  ;;  %v529_v17 = vld [vmem:[%s3647_s3 + $0x10] sm:$0xff] }
 0x110   : > { %752 = vst [vmem:[#allocation2 + $0xd8] sm:$0x1] %v3183_v0  ;;  %753 = vst [vmem:[#allocation2 + $0x11] sm:$0x1] %v3183_v0  ;;  %2418 = vmatprep.mubr.msk.f32.mxu0 %vm549_vm0, %v527_v9  ;;  %2430 = vmatprep.mubr.msk.f32.mxu1 %vm549_vm0, %v535_v10  ;;  %v537_v18 = vld [vmem:[%s3647_s3 + $0x50] sm:$0xff]  ;;  %v530_v19 = vld [vmem:[%s3647_s3 + $0x18] sm:$0xff] }
 0x111   : > { %754 = vst [vmem:[#allocation2 + $0x29] sm:$0x1] %v3183_v0  ;;  %755 = vst [vmem:[#allocation2 + $0x41] sm:$0x1] %v3183_v0  ;;  %v538_v20 = vld [vmem:[%s3647_s3 + $0x58] sm:$0xff]  ;;  %v531_v21 = vld [vmem:[%s3647_s3 + $0x20] sm:$0xff] }
 0x112   : > { %756 = vst [vmem:[#allocation2 + $0x59] sm:$0x1] %v3183_v0  ;;  %757 = vst [vmem:[#allocation2 + $0x71] sm:$0x1] %v3183_v0  ;;  %2543 = vmatpush3.bf16.msra.mxu0 %v3676_v6  ;;  %2621 = vmatpush3.bf16.msra.mxu1 %v3676_v6  ;;  %v539_v22 = vld [vmem:[%s3647_s3 + $0x60] sm:$0xff]  ;;  %v532_v23 = vld [vmem:[%s3647_s3 + $0x28] sm:$0xff] }
 0x113   : > { %758 = vst [vmem:[#allocation2 + $0x89] sm:$0x1] %v3183_v0  ;;  %759 = vst [vmem:[#allocation2 + $0xa1] sm:$0x1] %v3183_v0  ;;  %2545 = vmatprep.subr.bf16.mxu0 %v3686_v11  ;;  %2618 = vmatprep.subr.bf16.mxu1 %v3686_v11  ;;  %v540_v24 = vld [vmem:[%s3647_s3 + $0x68] sm:$0xff]  ;;  %v533_v25 = vld [vmem:[%s3647_s3 + $0x30] sm:$0xff] }
 0x114   : > { %760 = vst [vmem:[#allocation2 + $0xb9] sm:$0x1] %v3183_v0  ;;  %761 = vst [vmem:[#allocation2 + $0xd1] sm:$0x1] %v3183_v0  ;;  %v541_v26 = vld [vmem:[%s3647_s3 + $0x70] sm:$0xff]  ;;  %v534_v27 = vld [vmem:[%s3647_s3 + $0x38] sm:$0xff] }
 0x115   : > { %762 = vst [vmem:[#allocation2 + $0xe9] sm:$0x1] %v3183_v0  ;;  %v542_v28 = vld [vmem:[%s3647_s3 + $0x78] sm:$0xff]  ;;  %v3733_v29 = vld [vmem:[%s4717_s18] ss:$0 sm:$0xff]  ;;  %s3753_s26 = scalar_lea.vmem [#allocation12], %s2285_s21 }
 0x116   : > { %2547 = vmatpush3.bf16.msra.mxu0 %v3686_v11  ;;  %2622 = vmatpush3.bf16.msra.mxu1 %v3686_v11  ;;  %s4718_s11 = sld [smem:[#allocation22_spill]] }
 0x117   : > { %2549 = vmatprep.subr.bf16.mxu0 %v3694_v14  ;;  %2619 = vmatprep.subr.bf16.mxu1 %v3694_v14 }
 0x11a   : > { %2551 = vmatpush3.bf16.msra.mxu0 %v3694_v14  ;;  %2623 = vmatpush3.bf16.msra.mxu1 %v3694_v14 }
 0x11c   : > { %p2308_p10 = scmp.ne.s32.totalorder %s4718_s11, 0 }
 0x11d   : > { %2419 = vmatmul.mubr.msk.f32.vlgmr.msra.gmra.mrb[0].mxu0 %vm549_vm0, %v528_v15  ;;  %2431 = vmatmul.mubr.msk.f32.vlgmr.msra.gmra.mrb[0].mxu1 %vm549_vm0, %v536_v16  ;;  %v3184_v62 = vmov (!%p2308_p10), 0.0  }
 0x11e   : > { %2421 = vmatprep.mubr.msk.f32.mxu0 %vm549_vm0, %v529_v17  ;;  %2433 = vmatprep.mubr.msk.f32.mxu1 %vm549_vm0, %v537_v18  ;;  %784 = vst [vmem:[#allocation2 + $0x1] sm:$0xff] (!%p2308_p10), %v3184_v62  ;;  %785 = vst [vmem:[#allocation2 + $0x9] sm:$0xff] (!%p2308_p10), %v3184_v62 }
 0x121   : > { %2422 = vmatmul.mubr.msk.f32.gmra.mrb[2].mxu0 %vm549_vm0, %v530_v19  ;;  %2434 = vmatmul.mubr.msk.f32.gmra.mrb[2].mxu1 %vm549_vm0, %v538_v20 }
 0x122   : > { %2424 = vmatprep.mubr.msk.f32.mxu0 %vm549_vm0, %v531_v21  ;;  %2436 = vmatprep.mubr.msk.f32.mxu1 %vm549_vm0, %v539_v22 }
 0x125   : > { %2425 = vmatmul.mubr.msk.f32.gmra.mrb[4].mxu0 %vm549_vm0, %v532_v23  ;;  %2437 = vmatmul.mubr.msk.f32.gmra.mrb[4].mxu1 %vm549_vm0, %v540_v24 }
 0x126   : > { %2427 = vmatprep.mubr.msk.f32.mxu0 %vm549_vm0, %v533_v25  ;;  %2439 = vmatprep.mubr.msk.f32.mxu1 %vm549_vm0, %v541_v26 }
 0x129   : > { %2428 = vmatmul.mubr.msk.f32.gmra.mrb[6].mxu0 %vm549_vm0, %v534_v27  ;;  %2440 = vmatmul.mubr.msk.f32.gmra.mrb[6].mxu1 %vm549_vm0, %v542_v28 }
 0x1f0   : > { %v2420_v30 = vpop.f32.mrb[0].mxu0  ;;  %v2432_v31 = vpop.f32.mrb[0].mxu1 }
 0x1f1   : > { %v670_v32 = vadd.f32 %v2420_v30, %v3733_v29  ;;  %v710_v33 = vadd.f32 %v2432_v31, %v3733_v29  ;;  %v664_v34 = vpop.f32.mrb[1].mxu0  ;;  %v704_v35 = vpop.f32.mrb[1].mxu1 }
 0x1f2   : > { %v665_v36 = vadd.f32 %v3733_v29, %v664_v34  ;;  %v705_v37 = vadd.f32 %v3733_v29, %v704_v35 }
 0x1f3   : > { %765 = vst [vmem:[#allocation2 + $0x21] sm:$0xff] %v670_v32  ;;  %773 = vst [vmem:[#allocation2 + $0x81] sm:$0xff] %v710_v33 }
 0x1f4   : > { %764 = vst [vmem:[#allocation2 + $0x19] sm:$0xff] %v665_v36  ;;  %772 = vst [vmem:[#allocation2 + $0x79] sm:$0xff] %v705_v37  ;;  %v2423_v38 = vpop.f32.mrb[2].mxu0  ;;  %v2435_v39 = vpop.f32.mrb[2].mxu1 }
 0x1f5   : > { %v680_v40 = vadd.f32 %v2423_v38, %v3733_v29  ;;  %v720_v41 = vadd.f32 %v2435_v39, %v3733_v29  ;;  %v674_v42 = vpop.f32.mrb[3].mxu0  ;;  %v714_v43 = vpop.f32.mrb[3].mxu1 }
 0x1f6   : > { %v675_v44 = vadd.f32 %v3733_v29, %v674_v42  ;;  %v715_v45 = vadd.f32 %v3733_v29, %v714_v43 }
 0x1f7   : > { %767 = vst [vmem:[#allocation2 + $0x39] sm:$0xff] %v680_v40  ;;  %775 = vst [vmem:[#allocation2 + $0x99] sm:$0xff] %v720_v41 }
 0x1f8   : > { %766 = vst [vmem:[#allocation2 + $0x31] sm:$0xff] %v675_v44  ;;  %774 = vst [vmem:[#allocation2 + $0x91] sm:$0xff] %v715_v45  ;;  %v2426_v46 = vpop.f32.mrb[4].mxu0  ;;  %v2438_v47 = vpop.f32.mrb[4].mxu1 }
 0x1f9   : > { %v690_v48 = vadd.f32 %v2426_v46, %v3733_v29  ;;  %v730_v49 = vadd.f32 %v2438_v47, %v3733_v29  ;;  %v684_v50 = vpop.f32.mrb[5].mxu0  ;;  %v724_v51 = vpop.f32.mrb[5].mxu1 }
 0x1fa   : > { %v685_v52 = vadd.f32 %v3733_v29, %v684_v50  ;;  %v725_v53 = vadd.f32 %v3733_v29, %v724_v51  ;;  %783 = sbr.rel (%p2308_p10) target bundleno = 513 (0x201), region = 80 }
 0x1fb   : > { %769 = vst [vmem:[#allocation2 + $0x51] sm:$0xff] %v690_v48  ;;  %777 = vst [vmem:[#allocation2 + $0xb1] sm:$0xff] %v730_v49 }
 0x1fc   : > { %768 = vst [vmem:[#allocation2 + $0x49] sm:$0xff] %v685_v52  ;;  %776 = vst [vmem:[#allocation2 + $0xa9] sm:$0xff] %v725_v53  ;;  %v2429_v54 = vpop.f32.mrb[6].mxu0  ;;  %v2441_v55 = vpop.f32.mrb[6].mxu1 }
 0x1fd   : > { %v700_v56 = vadd.f32 %v2429_v54, %v3733_v29  ;;  %v740_v57 = vadd.f32 %v2441_v55, %v3733_v29  ;;  %v694_v58 = vpop.f32.mrb[7].mxu0  ;;  %v734_v59 = vpop.f32.mrb[7].mxu1 }
 0x1fe   : > { %v695_v60 = vadd.f32 %v3733_v29, %v694_v58  ;;  %v735_v61 = vadd.f32 %v3733_v29, %v734_v59 }
 0x1ff   : > { %771 = vst [vmem:[#allocation2 + $0x69] sm:$0xff] %v700_v56  ;;  %779 = vst [vmem:[#allocation2 + $0xc9] sm:$0xff] %v740_v57 }
 0x200   : > { %770 = vst [vmem:[#allocation2 + $0x61] sm:$0xff] %v695_v60  ;;  %778 = vst [vmem:[#allocation2 + $0xc1] sm:$0xff] %v735_v61 }
 0x201 PF: > { %s4719_s27 = sld [smem:[#allocation22_spill]] }
 0x207   : > { %p2309_p12 = scmp.le.s32.totalorder %s4719_s27, 0 }
 0x208   : > { %2553 = vmatprep.subr.bf16.mxu0 (!%p2309_p12), %v3674_v4  ;;  %v790_v63 = vld [vmem:[%s446_s1] sm:$0xff] (!%p2309_p12)  ;;  %v791_v0 = vld [vmem:[%s446_s1 + $0x8] sm:$0xff] (!%p2309_p12) }
 0x209   : > { %789 = sbr.rel (%p2309_p12) target bundleno = 752 (0x2f0), region = 84  ;;  %2555 = vmatpush3.bf16.msra.mxu0 (!%p2309_p12), %v3674_v4  ;;  %2458 = vmatprep.mubr.msk.f32.mxu0 (!%p2309_p12), %vm549_vm0, %v790_v63 }
 0x20a   : > { %2557 = vmatprep.subr.bf16.mxu0 (!%p2309_p12), %v3676_v6 }
 0x20d   : > { %2559 = vmatpush3.bf16.msra.mxu0 (!%p2309_p12), %v3676_v6 }
 0x20e   : > { %2561 = vmatprep.subr.bf16.mxu0 (!%p2309_p12), %v3686_v11 }
 0x211   : > { %2563 = vmatpush3.bf16.msra.mxu0 %v3686_v11 }
 0x212   : > { %2565 = vmatprep.subr.bf16.mxu0 %v3694_v14 }
 0x215   : > { %2567 = vmatpush3.bf16.msra.mxu0 %v3694_v14 }
 0x218   : > { %2459 = vmatmul.mubr.msk.f32.vlgmr.msra.gmra.mrb[0].mxu0 %vm549_vm0, %v791_v0 }
 0x2eb   : > { %v2460_v1 = vpop.f32.mrb[0].mxu0 }
 0x2ec   : > { %v870_v2 = vadd.f32 %v2460_v1, %v3733_v29  ;;  %v864_v3 = vpop.f32.mrb[1].mxu0 }
 0x2ed   : > { %v865_v5 = vadd.f32 %v3733_v29, %v864_v3 }
 0x2ee   : > { %874 = vst [vmem:[#allocation2 + $0x9] sm:$0xff] %v870_v2 }
 0x2ef   : > { %873 = vst [vmem:[#allocation2 + $0x1] sm:$0xff] %v865_v5 }
 0x2f0 PF: > { %s4720_s21 = sld [smem:[#allocation22_spill]] }
 0x2f6   : > { %p2312_p2 = scmp.ne.s32.totalorder %s4720_s21, 1 }
 0x2f7   : > { %v3185_v7 = vmov (!%p2312_p2), 0.0  }
 0x2f8   : > { %878 = sbr.rel (%p2312_p2) target bundleno = 767 (0x2ff), region = 88  ;;  %880 = vst [vmem:[#allocation2 + $0xd9] sm:$0xff] (!%p2312_p2), %v3185_v7  ;;  %881 = vst [vmem:[#allocation2 + $0xe1] sm:$0xff] (!%p2312_p2), %v3185_v7 }
 0x2ff PF: > { %s4721_s3 = sld [smem:[#allocation22_spill]] }
 0x305   : > { %p2313_p0 = scmp.ge.s32.totalorder %s4721_s3, 1 }
 0x306   : > { %2569 = vmatprep.subr.bf16.mxu0 (!%p2313_p0), %v3674_v4  ;;  %v886_v8 = vld [vmem:[%s455_s9] sm:$0xff] (!%p2313_p0)  ;;  %v887_v9 = vld [vmem:[%s455_s9 + $0x8] sm:$0xff] (!%p2313_p0) }
 0x307   : > { %885 = sbr.rel (%p2313_p0) target bundleno = 1006 (0x3ee), region = 92  ;;  %2571 = vmatpush3.bf16.msra.mxu0 (!%p2313_p0), %v3674_v4  ;;  %2477 = vmatprep.mubr.msk.f32.mxu0 (!%p2313_p0), %vm549_vm0, %v886_v8 }
 0x308   : > { %2573 = vmatprep.subr.bf16.mxu0 (!%p2313_p0), %v3676_v6 }
 0x30b   : > { %2575 = vmatpush3.bf16.msra.mxu0 (!%p2313_p0), %v3676_v6 }
 0x30c   : > { %2577 = vmatprep.subr.bf16.mxu0 (!%p2313_p0), %v3686_v11 }
 0x30f   : > { %2579 = vmatpush3.bf16.msra.mxu0 %v3686_v11 }
 0x310   : > { %2581 = vmatprep.subr.bf16.mxu0 %v3694_v14 }
 0x313   : > { %2583 = vmatpush3.bf16.msra.mxu0 %v3694_v14 }
 0x316   : > { %2478 = vmatmul.mubr.msk.f32.vlgmr.msra.gmra.mrb[0].mxu0 %vm549_vm0, %v887_v9 }
 0x3e9   : > { %v2479_v10 = vpop.f32.mrb[0].mxu0 }
 0x3ea   : > { %v966_v4 = vadd.f32 %v2479_v10, %v3733_v29  ;;  %v960_v12 = vpop.f32.mrb[1].mxu0 }
 0x3eb   : > { %v961_v13 = vadd.f32 %v3733_v29, %v960_v12 }
 0x3ec   : > { %971 = vst [vmem:[#allocation2 + $0xe1] sm:$0xff] %v966_v4 }
 0x3ed   : > { %970 = vst [vmem:[#allocation2 + $0xd9] sm:$0xff] %v961_v13 }
 0x3ee PF: > { %v1898_v6 = vld [vmem:[#allocation11] sm:$0xff]  ;;  %v1899_v15 = vld [vmem:[#allocation11 + $0x8] sm:$0xff]  ;;  %v1900_v11 = vld [vmem:[#allocation11 + $0x10] sm:$0xff]  ;;  %v990_v16 = vlaneseq  ;;  %s4722_s30 = sld [smem:[#allocation53_spill]]  ;;  %s4732_s7 = sld [smem:[#allocation54_spill]] }
 0x3ef   : > { %v2584_v17 = vpack.c.bf16 %v1899_v15, %v1898_v6  ;;  %v1901_v18 = vld [vmem:[#allocation11 + $0x18] sm:$0xff]  ;;  %v1902_v19 = vld [vmem:[#allocation11 + $0x20] sm:$0xff]  ;;  %v1903_v20 = vld [vmem:[#allocation11 + $0x28] sm:$0xff]  ;;  %s4759_s27 = sld [smem:[#allocation56_spill]]  ;;  %s4760_s21 = sld [smem:[#allocation22_spill]] }
 0x3f0   : > { %v2588_v14 = vpack.c.bf16 %v1901_v18, %v1900_v11  ;;  %v991_v21 = vshrl.u32 %v990_v16, 7  ;;  %v1904_v22 = vld [vmem:[#allocation11 + $0x30] sm:$0xff]  ;;  %v1905_v23 = vld [vmem:[#allocation11 + $0x38] sm:$0xff]  ;;  %v1906_v24 = vld [vmem:[#allocation11 + $0x40] sm:$0xff]  ;;  %v2592_v28 = vpack.c.bf16 %v1903_v20, %v1902_v19  ;;  %s4761_s3 = sld [smem:[#allocation23_spill]]  ;;  %s2098_s13 = sshll.u32 %s3753_s26, 4  ;;  %s4509_s13 = int_to_ptr.vmem [resolvable:$true] %s2098_s13 }
 0x3f1   : > { %2585 = vmatprep.subr.bf16.mxu0 %v2584_v17  ;;  %2624 = vmatprep.subr.bf16.mxu1 %v2584_v17  ;;  %v1907_v25 = vld [vmem:[#allocation11 + $0x48] sm:$0xff]  ;;  %v1908_v29 = vld [vmem:[#allocation11 + $0x50] sm:$0xff]  ;;  %v1909_v30 = vld [vmem:[#allocation11 + $0x58] sm:$0xff]  ;;  %v3794_v34 = vpack.c.bf16 %v1905_v23, %v1904_v22  ;;  %s4762_s4 = sld [smem:[#allocation57_spill]]  ;;  %s2083_s23 = scalar_lea.sflag [#allocation5], %s3641_s28 }
 0x3f2   : > { %2587 = vmatpush3.bf16.msra.mxu0 %v2584_v17  ;;  %2632 = vmatpush3.bf16.msra.mxu1 %v2584_v17  ;;  %v992_v26 = vsub.s32 0, %v991_v21  ;;  %v1044_v27 = vsub.s32 1, %v991_v21  ;;  %v1096_v32 = vsub.s32 2, %v991_v21  ;;  %v1148_v33 = vsub.s32 3, %v991_v21  ;;  %v974_v35 = vld [vmem:[#allocation2] sm:$0xff]  ;;  %v3802_v42 = vld [vmem:[#allocation2 + $0x18] sm:$0xff] }
 0x3f3   : > { %2589 = vmatprep.subr.bf16.mxu0 %v2588_v14  ;;  %2625 = vmatprep.subr.bf16.mxu1 %v2588_v14  ;;  %v1026_v37 = vld [vmem:[#allocation2 + $0x1] sm:$0xff]  ;;  %v1200_v40 = vsub.s32 4, %v991_v21  ;;  %v1252_v44 = vsub.s32 5, %v991_v21  ;;  %v1305_v45 = vsub.s32 6, %v991_v21  ;;  %v1910_v46 = vld [vmem:[#allocation11 + $0x60] sm:$0xff]  ;;  %v1911_v47 = vld [vmem:[#allocation11 + $0x68] sm:$0xff]  ;;  %v3810_v53 = vpack.c.bf16 %v1907_v25, %v1906_v24 }
 0x3f4   : > { %s4723_s5 = smov %s4722_s30  ;;  %v972_v31 = vld [vmem:[%s4722_s30] sm:$0xff]  ;;  %v1357_v52 = vsub.s32 7, %v991_v21  ;;  %v3812_v54 = vpack.c.bf16 %v1909_v30, %v1908_v29  ;;  %v1913_v55 = vld [vmem:[#allocation11 + $0x78] sm:$0xff]  ;;  %v3827_v0 = vld [vmem:[#allocation2 + $0x78] sm:$0xff]  ;;  %v3829_v1 = vpack.c.bf16 %v1911_v47, %v1910_v46  ;;  %s3016_s6 = scalar_lea.vmem %s4509_s13, 2048 }
 0x3f5   : > { %v3796_v36 = vrot.slane %v972_v31, %v992_v26  ;;  %v3798_v38 = vrot.slane %v972_v31, %v1044_v27  ;;  %v1078_v39 = vld [vmem:[#allocation2 + $0x2] sm:$0xff]  ;;  %v3800_v41 = vrot.slane %v972_v31, %v1096_v32  ;;  %v3804_v43 = vrot.slane %v972_v31, %v1148_v33  ;;  %v3836_v3 = vld [vmem:[#allocation2 + $0x19] sm:$0xff]  ;;  %v3850_v13 = vld [vmem:[#allocation2 + $0x30] sm:$0xff]  ;;  %s2320_s0 = sshll.u32 %s4760_s21, 4  ;;  %p3017_p13 = scmp.ne.s32.totalorder %s4509_s13, %s3016_s6 }
 0x3f6   : > { %2591 = vmatpush3.bf16.msra.mxu0 %v2588_v14  ;;  %2633 = vmatpush3.bf16.msra.mxu1 %v2588_v14  ;;  %v1912_v48 = vld [vmem:[#allocation11 + $0x70] sm:$0xff]  ;;  %v3808_v51 = vrot.slane %v972_v31, %v1200_v40  ;;  %v3821_v61 = vrot.slane %v972_v31, %v1252_v44  ;;  %v3823_v62 = vrot.slane %v972_v31, %v1305_v45  ;;  %v3834_v2 = vld [vmem:[%s4723_s5 + $0x8] ss:$0 sm:$0xff]  ;;  %v3854_v15 = vld [vmem:[#allocation2 + $0x32] sm:$0xff]  ;;  %s2321_s20 = sshll.u32 %s4761_s3, 5  ;;  %p4763_p1 = scmp.ne.s32.totalorder %s4688_s25, 0 }
 0x3f7   : > { %v994_v49 = vmul.f32 %v3796_v36, %v974_v35  ;;  %v1046_v50 = vmul.f32 %v3798_v38, %v1026_v37  ;;  %2593 = vmatprep.subr.bf16.mxu0 %v2592_v28  ;;  %2626 = vmatprep.subr.bf16.mxu1 %v2592_v28  ;;  %v1098_v56 = vmul.f32 %v3800_v41, %v1078_v39  ;;  %v3815_v57 = vld [vmem:[#allocation2 + $0x60] sm:$0xff]  ;;  %v975_v6 = vld [vmem:[#allocation2 + $0x8] sm:$0xff]  ;;  %v3864_v22 = vld [vmem:[#allocation2 + $0x31] sm:$0xff]  ;;  %s2095_s30 = sadd.s32 %s2321_s20, %s2320_s0  ;;  %s3186_s18 = smov [#allocation12]  }
 0x3f8   : > { %v3817_v58 = vld [vmem:[#allocation2 + $0x61] sm:$0xff]  ;;  %v1150_v60 = vmul.f32 %v3804_v43, %v3802_v42  ;;  %v3838_v5 = vrot.slane %v972_v31, %v1357_v52  ;;  %v1002_v7 = vmul.f32 %v3796_v36, %v3815_v57  ;;  %v3844_v9 = vpack.c.bf16 %v1913_v55, %v1912_v48  ;;  %v1027_v18 = vld [vmem:[#allocation2 + $0x9] sm:$0xff]  ;;  %v3868_v24 = vld [vmem:[#allocation2 + $0x79] sm:$0xff]  ;;  %s2322_s10 = sshll.u32 %s2095_s30, 7  ;;  %p3018_p8 = pnand %p3017_p13, %p4763_p1 }
 0x3f9   : > { %4724 = vst [vmem:[#allocation31_spill] sm:$0xff] %v3817_v58  ;;  %v1062_v59 = vadd.f32 %v1046_v50, %v994_v49  ;;  %v3825_v63 = vld [vmem:[#allocation2 + $0x62] sm:$0xff]  ;;  %v1054_v8 = vmul.f32 %v3798_v38, %v3817_v58  ;;  %v1202_v4 = vmul.f32 %v3808_v51, %v3836_v3  ;;  %v3848_v12 = vld [vmem:[#allocation2 + $0x1a] sm:$0xff]  ;;  %v1158_v17 = vmul.f32 %v3804_v43, %v3827_v0  ;;  %v1079_v14 = vld [vmem:[#allocation2 + $0xa] sm:$0xff]  ;;  %s4507_s9 = scalar_lea.hbm %s4762_s4, %s2322_s10  ;;  %s3020_s11 = sshll.u32 %s3186_s18, 4  ;;  %s3021_s11 = int_to_ptr.vmem [resolvable:$false] %s3020_s11 }
 0x3fa   : > { %4725 = vst [vmem:[#allocation32_spill] sm:$0xff] %v3825_v63  ;;  %2595 = vmatpush3.bf16.msra.mxu0 %v2592_v28  ;;  %2634 = vmatpush3.bf16.msra.mxu1 %v2592_v28  ;;  %v1106_v16 = vmul.f32 %v3800_v41, %v3825_v63  ;;  %v1254_v20 = vmul.f32 %v3821_v61, %v3848_v12  ;;  %v3875_v29 = vld [vmem:[#allocation2 + $0x20] sm:$0xff]  ;;  %v3881_v32 = vld [vmem:[#allocation2 + $0x90] sm:$0xff]  ;;  %v3885_v37 = vld [vmem:[#allocation2 + $0x68] sm:$0xff]  ;;  %p3019_p5 = pneg %p3018_p8  ;;  %p3023_p6 = scmp.lt.s32.totalorder %s4509_s13, %s3021_s11 }
 0x3fb   : > { %v1114_v10 = vadd.f32 %v1098_v56, %v1062_v59  ;;  %2597 = vmatprep.subr.bf16.mxu0 %v3794_v34  ;;  %2627 = vmatprep.subr.bf16.mxu1 %v3794_v34  ;;  %v1070_v11 = vadd.f32 %v1054_v8, %v1002_v7  ;;  %v1307_v21 = vmul.f32 %v3823_v62, %v3850_v13  ;;  %v3879_v31 = vld [vmem:[#allocation2 + $0x7a] sm:$0xff]  ;;  %v3893_v44 = vld [vmem:[#allocation2 + $0x91] sm:$0xff]  ;;  %v3895_v45 = vld [vmem:[#allocation2 + $0x69] sm:$0xff] }
 0x3fc   : > { %v1411_v23 = vmul.f32 %v3834_v2, %v3854_v15  ;;  %v1359_v25 = vmul.f32 %v3838_v5, %v3864_v22  ;;  %v1210_v27 = vmul.f32 %v3808_v51, %v3868_v24  ;;  %v995_v28 = vmul.f32 %v3796_v36, %v975_v6  ;;  %4726 = vst [vmem:[#allocation33_spill] sm:$0xff] %v3885_v37  ;;  %v3899_v48 = vld [vmem:[#allocation2 + $0x92] sm:$0xff]  ;;  %v3903_v52 = vld [vmem:[#allocation2 + $0x21] sm:$0xff]  ;;  %v3905_v55 = vld [vmem:[#allocation2 + $0x6a] sm:$0xff] }
 0x3fd   : > { %v1166_v19 = vadd.f32 %v1150_v60, %v1114_v10  ;;  %v1122_v26 = vadd.f32 %v1106_v16, %v1070_v11  ;;  %v1047_v33 = vmul.f32 %v3798_v38, %v1027_v18  ;;  %v1099_v35 = vmul.f32 %v3800_v41, %v1079_v14  ;;  %4727 = vst [vmem:[#allocation34_spill] sm:$0xff] %v3895_v45  ;;  %v3913_v8 = vld [vmem:[#allocation2 + $0x80] sm:$0xff] }
 0x3fe   : > { %2599 = vmatpush3.bf16.msra.mxu0 %v3794_v34  ;;  %2635 = vmatpush3.bf16.msra.mxu1 %v3794_v34  ;;  %v1262_v40 = vmul.f32 %v3821_v61, %v3879_v31  ;;  %v1315_v34 = vmul.f32 %v3823_v62, %v3881_v32  ;;  %v1367_v47 = vmul.f32 %v3838_v5, %v3893_v44  ;;  %v3917_v6 = vld [vmem:[#allocation2 + $0x22] sm:$0xff] }
 0x3ff   : > { %v1218_v30 = vadd.f32 %v1202_v4, %v1166_v19  ;;  %2601 = vmatprep.subr.bf16.mxu0 %v3810_v53  ;;  %2628 = vmatprep.subr.bf16.mxu1 %v3810_v53  ;;  %v1174_v39 = vadd.f32 %v1158_v17, %v1122_v26  ;;  %4728 = vst [vmem:[#allocation35_spill] sm:$0xff] %v3899_v48  ;;  %4729 = vst [vmem:[#allocation36_spill] sm:$0xff] %v3905_v55  ;;  %v3927_v19 = vld [vmem:[#allocation2 + $0x38] sm:$0xff] }
 0x400   : > { %v1063_v49 = vadd.f32 %v1047_v33, %v995_v28  ;;  %v1151_v50 = vmul.f32 %v3804_v43, %v3875_v29  ;;  %v1419_v59 = vmul.f32 %v3834_v2, %v3899_v48  ;;  %v1203_v60 = vmul.f32 %v3808_v51, %v3903_v52  ;;  %4730 = vst [vmem:[#allocation37_spill] sm:$0xff] %v3927_v19  ;;  %v3938_v28 = vld [vmem:[%s4732_s7] ss:$0 sm:$0xff] }
 0x401   : > { %v1270_v46 = vadd.f32 %v1254_v20, %v1218_v30  ;;  %v1226_v56 = vadd.f32 %v1210_v27, %v1174_v39  ;;  %v1003_v7 = vmul.f32 %v3796_v36, %v3885_v37  ;;  %v1055_v11 = vmul.f32 %v3798_v38, %v3895_v45  ;;  %v3929_v20 = vld [vmem:[#allocation2 + $0x39] sm:$0xff]  ;;  %v3933_v27 = vld [vmem:[#allocation2 + $0x81] sm:$0xff]  ;;  %v4073_v37 = vld [vmem:[#allocation2 + $0xaa] sm:$0xff] }
 0x402   : > { %2603 = vmatpush3.bf16.msra.mxu0 %v3810_v53  ;;  %2636 = vmatpush3.bf16.msra.mxu1 %v3810_v53  ;;  %v1115_v4 = vadd.f32 %v1099_v35, %v1063_v49  ;;  %v1255_v17 = vmul.f32 %v3821_v61, %v3917_v6  ;;  %v1107_v18 = vmul.f32 %v3800_v41, %v3905_v55  ;;  %v3948_v49 = vld [vmem:[#allocation2 + $0x82] sm:$0xff] }
 0x403   : > { %v1323_v10 = vadd.f32 %v1307_v21, %v1270_v46  ;;  %2605 = vmatprep.subr.bf16.mxu0 %v3812_v54  ;;  %2629 = vmatprep.subr.bf16.mxu1 %v3812_v54  ;;  %v1278_v16 = vadd.f32 %v1262_v40, %v1226_v56  ;;  %4731 = vst [vmem:[#allocation38_spill] sm:$0xff] %v3929_v20  ;;  %4736 = vst [vmem:[#allocation42_spill] sm:$0xff] %v4073_v37 }
 0x404   : > { %v1167_v53 = vadd.f32 %v1151_v50, %v1115_v4  ;;  %v1071_v21 = vadd.f32 %v1055_v11, %v1003_v7  ;;  %v1159_v26 = vmul.f32 %v3804_v43, %v3913_v8  ;;  %v1360_v33 = vmul.f32 %v3838_v5, %v3929_v20  ;;  %v3965_v11 = vld [vmem:[#allocation2 + $0x98] sm:$0xff] }
 0x405   : > { %v1375_v14 = vadd.f32 %v1359_v25, %v1323_v10  ;;  %v1331_v30 = vadd.f32 %v1315_v34, %v1278_v16  ;;  %v1308_v25 = vmul.f32 %v3823_v62, %v3927_v19  ;;  %v1211_v35 = vmul.f32 %v3808_v51, %v3933_v27 }
 0x406   : > { %2607 = vmatpush3.bf16.msra.mxu0 %v3812_v54  ;;  %2637 = vmatpush3.bf16.msra.mxu1 %v3812_v54  ;;  %v1219_v40 = vadd.f32 %v1203_v60, %v1167_v53  ;;  %v1123_v46 = vadd.f32 %v1107_v18, %v1071_v21  ;;  %v1263_v50 = vmul.f32 %v3821_v61, %v3948_v49 }
 0x407   : > { %v1427_v39 = vadd.f32 %v1411_v23, %v1375_v14  ;;  %2609 = vmatprep.subr.bf16.mxu0 %v3829_v1  ;;  %2630 = vmatprep.subr.bf16.mxu1 %v3829_v1  ;;  %v1383_v34 = vadd.f32 %v1367_v47, %v1331_v30  ;;  %v996_v56 = vmul.f32 %v3802_v42, %v3796_v36  ;;  %v3959_v23 = vld [vmem:[#allocation2 + $0x3a] sm:$0xff] }
 0x408   : > { %v1271_v54 = vadd.f32 %v1255_v17, %v1219_v40  ;;  %4733 = vst [vmem:[#allocation39_spill] sm:$0xff] %v3959_v23  ;;  %v1175_v60 = vadd.f32 %v1159_v26, %v1123_v46  ;;  %v1048_v10 = vmul.f32 %v3836_v3, %v3798_v38  ;;  %v1412_v47 = vmul.f32 %v3834_v2, %v3959_v23 }
 0x409   : > { %v3957_v7 = vadd.f32 %v3938_v28, %v1427_v39  ;;  %v1435_v4 = vadd.f32 %v1419_v59, %v1383_v34  ;;  %v1100_v16 = vmul.f32 %v3848_v12, %v3800_v41  ;;  %v1316_v3 = vmul.f32 %v3823_v62, %v3965_v11  ;;  %v3981_v12 = vld [vmem:[#allocation2 + $0x99] sm:$0xff] }
 0x40a   : > { %2611 = vmatpush3.bf16.msra.mxu0 %v3829_v1  ;;  %2638 = vmatpush3.bf16.msra.mxu1 %v3829_v1  ;;  %v1324_v17 = vadd.f32 %v1308_v25, %v1271_v54  ;;  %v1227_v18 = vadd.f32 %v1211_v35, %v1175_v60  ;;  %v1064_v14 = vadd.f32 %v1048_v10, %v996_v56  ;;  %v3991_v35 = vld [vmem:[#allocation2 + $0x9a] sm:$0xff] }
 0x40b   : > { %v3972_v42 = vmul.f32 0.70710677, %v3957_v7  ;;  %2613 = vmatprep.subr.bf16.mxu0 %v3844_v9  ;;  %2631 = vmatprep.subr.bf16.mxu1 %v3844_v9  ;;  %v3979_v59 = vadd.f32 %v3938_v28, %v1435_v4  ;;  %v1152_v1 = vmul.f32 %v3850_v13, %v3804_v43  ;;  %v1368_v30 = vmul.f32 %v3838_v5, %v3981_v12 }
 0x40c   : > { %v1376_v21 = vadd.f32 %v1360_v33, %v1324_v17  ;;  %v1279_v26 = vadd.f32 %v1263_v50, %v1227_v18  ;;  %v1116_v39 = vadd.f32 %v1100_v16, %v1064_v14  ;;  %v1204_v40 = vmul.f32 %v3864_v22, %v3808_v51  ;;  %v4003_v18 = vld [vmem:[#allocation2 + $0x48] sm:$0xff] }
 0x40d   : > { %v1498_v53 = vand.u32 2147483647, %v3972_v42  ;;  %v3989_v25 = vmul.f32 0.70710677, %v3979_v59  ;;  %v1420_v50 = vmul.f32 %v3834_v2, %v3991_v35  ;;  %v1256_v10 = vmul.f32 %v3854_v15, %v3821_v61 }
 0x40e   : > { %2615 = vmatpush3.bf16.msra.mxu0 %v3844_v9  ;;  %2639 = vmatpush3.bf16.msra.mxu1 %v3844_v9  ;;  %v1428_v34 = vadd.f32 %v1412_v47, %v1376_v21  ;;  %v1332_v33 = vadd.f32 %v1316_v3, %v1279_v26  ;;  %v1168_v60 = vadd.f32 %v1152_v1, %v1116_v39  ;;  %v4007_v21 = vld [vmem:[#allocation2 + $0x49] sm:$0xff]  ;;  %vm1818_vm1 = vcmp.ge.f32.partialorder %v3972_v42, 0.0 }
 0x40f   : > { %v1514_v46 = vmul.f32 0.3275911, %v1498_v53  ;;  %v1722_v56 = vmul.f32 %v1498_v53, %v1498_v53  ;;  %v1506_v54 = vand.u32 2147483647, %v3989_v25  ;;  %v1309_v3 = vmul.f32 %v3823_v62, %v4003_v18 }
 0x410   : > { %v1451_v16 = vadd.f32 %v3938_v28, %v1428_v34  ;;  %v1384_v17 = vadd.f32 %v1368_v30, %v1332_v33  ;;  %v1220_v47 = vadd.f32 %v1204_v40, %v1168_v60  ;;  %v1361_v1 = vmul.f32 %v3838_v5, %v4007_v21 }
 0x411   : > { %v1530_v4 = vadd.f32 1.0, %v1514_v46  ;;  %v1522_v9 = vmul.f32 0.3275911, %v1506_v54  ;;  %v1730_v14 = vmul.f32 %v1506_v54, %v1506_v54  ;;  %v1738_v26 = vsub.f32 0.0, %v1722_v56  ;;  %v4014_v54 = vld [vmem:[#allocation2 + $0x4a] sm:$0xff] }
 0x412   : > { %v4009_v53 = vmul.f32 0.70710677, %v1451_v16  ;;  %v1436_v46 = vadd.f32 %v1420_v50, %v1384_v17  ;;  %v1272_v30 = vadd.f32 %v1256_v10, %v1220_v47  ;;  %v1004_v40 = vmul.f32 %v3827_v0, %v3796_v36 }
 0x413   : > { %2804 = vrcp.f32 %v1530_v4  ;;  %v1538_v39 = vadd.f32 1.0, %v1522_v9  ;;  %v1746_v34 = vsub.f32 0.0, %v1730_v14  ;;  %v1413_v55 = vmul.f32 %v3834_v2, %v4014_v54 }
 0x414   : > { %v1499_v33 = vand.u32 2147483647, %v4009_v53  ;;  %v4019_v60 = vadd.f32 %v3938_v28, %v1436_v46  ;;  %v1325_v4 = vadd.f32 %v1309_v3, %v1272_v30  ;;  %v1056_v50 = vmul.f32 %v3868_v24, %v3798_v38 }
 0x415   : > { %2806 = vrcp.f32 %v1538_v39  ;;  %v1108_v10 = vmul.f32 %v3879_v31, %v3800_v41  ;;  %v1754_v17 = vmul.f32 1.442695, %v1738_v26  ;;  %v1770_v47 = vmul.f32 1.442695, %v1746_v34 }
 0x416   : > { %v1515_v56 = vmul.f32 0.3275911, %v1499_v33  ;;  %v1723_v9 = vmul.f32 %v1499_v33, %v1499_v33  ;;  %v4028_v14 = vmul.f32 0.70710677, %v4019_v60  ;;  %v1377_v0 = vadd.f32 %v1361_v1, %v1325_v4 }
 0x417   : > { %v1072_v46 = vadd.f32 %v1056_v50, %v1004_v40  ;;  %v1160_v3 = vmul.f32 %v3881_v32, %v3804_v43  ;;  %v4034_v24 = vmul.f32 0.5, %v3957_v7  ;;  %v1212_v26 = vmul.f32 %v3893_v44, %v3808_v51 }
 0x418   : > { %v1531_v39 = vadd.f32 1.0, %v1515_v56  ;;  %v1739_v30 = vsub.f32 0.0, %v1723_v9  ;;  %v1507_v33 = vand.u32 2147483647, %v4028_v14  ;;  %v1429_v45 = vadd.f32 %v1413_v55, %v1377_v0  ;;  %v4050_v9 = vld [vmem:[#allocation2 + $0xa8] sm:$0xff] }
 0x419   : > { %v1124_v31 = vadd.f32 %v1108_v10, %v1072_v46  ;;  %v4039_v1 = vmul.f32 0.5, %v3979_v59  ;;  %v4046_v55 = vmul.f32 0.5, %v1451_v16  ;;  %v1264_v56 = vmul.f32 %v3899_v48, %v3821_v61  ;;  %4734 = vst [vmem:[#allocation40_spill] sm:$0xff] %v4050_v9 }
 0x41a   : > { %2808 = vrcp.f32 %v1531_v39  ;;  %v1523_v34 = vmul.f32 0.3275911, %v1507_v33  ;;  %v4042_v40 = vadd.f32 %v3938_v28, %v1429_v45  ;;  %v1756_v10 = vmul.f32 1.442695, %v1739_v30  ;;  %v4064_v30 = vld [vmem:[#allocation2 + $0xa9] sm:$0xff] }
 0x41b   : > { %2810 = vpow2.f32 %v1754_v17  ;;  %v1176_v7 = vadd.f32 %v1160_v3, %v1124_v31  ;;  %v1317_v17 = vmul.f32 %v3823_v62, %v4050_v9  ;;  %v997_v16 = vmul.f32 %v3875_v29, %v3796_v36  ;;  %4735 = vst [vmem:[#allocation41_spill] sm:$0xff] %v4064_v30 }
 0x41c   : > { %2812 = vpow2.f32 %v1770_v47  ;;  %v1539_v59 = vadd.f32 1.0, %v1523_v34  ;;  %v4056_v45 = vmul.f32 0.70710677, %v4042_v40  ;;  %v1049_v47 = vmul.f32 %v3903_v52, %v3798_v38 }
 0x41d   : > { %v4044_v4 = vpop.eup %2804  ;;  %v1228_v0 = vadd.f32 %v1212_v26, %v1176_v7  ;;  %v1731_v3 = vmul.f32 %v1507_v33, %v1507_v33  ;;  %v1101_v31 = vmul.f32 %v3917_v6, %v3800_v41  ;;  %v1369_v29 = vmul.f32 %v3838_v5, %v4064_v30 }
 0x41e   : > { %v1578_v50 = vmul.f32 1.0614054, %v4044_v4  ;;  %2814 = vrcp.f32 %v1539_v59  ;;  %v1500_v26 = vand.u32 2147483647, %v4056_v45  ;;  %v1153_v33 = vmul.f32 %v3927_v19, %v3804_v43 }
 0x41f   : > { %v4062_v39 = vpop.eup %2806  ;;  %v1280_v7 = vadd.f32 %v1264_v56, %v1228_v0  ;;  %2816 = vpow2.f32 %v1756_v10  ;;  %v1421_v58 = vmul.f32 %v3834_v2, %v4073_v37  ;;  %v1747_v56 = vsub.f32 0.0, %v1731_v3 }
 0x420   : > { %v1594_v46 = vadd.f32 -1.4531521, %v1578_v50  ;;  %v1586_v34 = vmul.f32 1.0614054, %v4062_v39  ;;  %v1065_v50 = vadd.f32 %v1049_v47, %v997_v16  ;;  %v1516_v63 = vmul.f32 0.3275911, %v1500_v26 }
 0x421   : > { %v1333_v6 = vadd.f32 %v1317_v17, %v1280_v7  ;;  %v1205_v30 = vmul.f32 %v3929_v20, %v3808_v51  ;;  %v1724_v47 = vmul.f32 %v1500_v26, %v1500_v26  ;;  %v1257_v3 = vmul.f32 %v3959_v23, %v3821_v61 }
 0x422   : > { %v1610_v52 = vmul.f32 %v4044_v4, %v1594_v46  ;;  %v1602_v59 = vadd.f32 -1.4531521, %v1586_v34  ;;  %v1117_v0 = vadd.f32 %v1101_v31, %v1065_v50  ;;  %v1532_v16 = vadd.f32 1.0, %v1516_v63 }
 0x423   : > { %v1385_v48 = vadd.f32 %v1369_v29, %v1333_v6  ;;  %v4089_v50 = vmul.f32 0.5, %v4019_v60  ;;  %v1772_v6 = vmul.f32 1.442695, %v1747_v56  ;;  %vm1826_vm2 = vcmp.ge.f32.partialorder %v3989_v25, 0.0 }
 0x424   : > { %v1626_v9 = vadd.f32 1.4214138, %v1610_v52  ;;  %v4081_v46 = vpop.eup %2808  ;;  %v1618_v10 = vmul.f32 %v4062_v39, %v1602_v59  ;;  %v1169_v7 = vadd.f32 %v1153_v33, %v1117_v0  ;;  %2818 = vrcp.f32 %v1532_v16  ;;  %v4091_v59 = vld [vmem:[#allocation2 + $0x50] sm:$0xff] }
 0x425   : > { %v2811_v19 = vpop.eup %2810  ;;  %v1579_v17 = vmul.f32 1.0614054, %v4081_v46  ;;  %v1437_v20 = vadd.f32 %v1421_v58, %v1385_v48  ;;  %4737 = vst [vmem:[#allocation43_spill] sm:$0xff] %v4091_v59  ;;  %v1740_v0 = vsub.f32 0.0, %v1724_v47  ;;  %v4109_v47 = vld [vmem:[#allocation2 + $0x52] sm:$0xff]  ;;  %2820 = vpow2.f32 %v1772_v6 }
 0x426   : > { %v1642_v34 = vmul.f32 %v4044_v4, %v1626_v9  ;;  %v2813_v31 = vpop.eup %2812  ;;  %v1634_v52 = vadd.f32 1.4214138, %v1618_v10  ;;  %v1221_v29 = vadd.f32 %v1205_v30, %v1169_v7  ;;  %v1310_v9 = vmul.f32 %v3823_v62, %v4091_v59  ;;  %v4099_v10 = vld [vmem:[#allocation2 + $0x51] sm:$0xff]  ;;  %4740 = vst [vmem:[#allocation46_spill] sm:$0xff] %v4109_v47 }
 0x427   : > { %v1595_v26 = vadd.f32 -1.4531521, %v1579_v17  ;;  %v4097_v23 = vadd.f32 %v3938_v28, %v1437_v20  ;;  %4739 = vst [vmem:[#allocation45_spill] sm:$0xff] %v4099_v10  ;;  %v1362_v30 = vmul.f32 %v3838_v5, %v4099_v10  ;;  %v1005_v20 = vmul.f32 %v3913_v8, %v3796_v36 }
 0x428   : > { %v1658_v63 = vadd.f32 -0.28449672, %v1642_v34  ;;  %v1650_v33 = vmul.f32 %v4062_v39, %v1634_v52  ;;  %v4101_v60 = vpop.eup %2814  ;;  %v1273_v16 = vadd.f32 %v1257_v3, %v1221_v29  ;;  %v1057_v17 = vmul.f32 %v3933_v27, %v3798_v38 }
 0x429   : > { %4738 = vst [vmem:[#allocation44_spill] sm:$0xff] %v4097_v23  ;;  %v1611_v48 = vmul.f32 %v4081_v46, %v1595_v26  ;;  %v1587_v56 = vmul.f32 1.0614054, %v4101_v60  ;;  %v2817_v7 = vpop.eup %2816  ;;  %v4116_v3 = vmul.f32 0.70710677, %v4097_v23  ;;  %v4120_v10 = vmul.f32 0.5, %v4042_v40 }
 0x42a   : > { %v1674_v58 = vmul.f32 %v4044_v4, %v1658_v63  ;;  %v1666_v34 = vadd.f32 -0.28449672, %v1650_v33  ;;  %v1326_v26 = vadd.f32 %v1310_v9, %v1273_v16  ;;  %v1414_v59 = vmul.f32 %v3834_v2, %v4109_v47 }
 0x42b   : > { %v1627_v63 = vadd.f32 1.4214138, %v1611_v48  ;;  %v1603_v33 = vadd.f32 -1.4531521, %v1587_v56  ;;  %4741 = vst [vmem:[#allocation47_spill] sm:$0xff] %v4120_v10  ;;  %v1073_v37 = vadd.f32 %v1057_v17, %v1005_v20  ;;  %v1109_v6 = vmul.f32 %v3948_v49, %v3800_v41 }
 0x42c   : > { %v1690_v52 = vadd.f32 0.2548296, %v1674_v58  ;;  %v1682_v29 = vmul.f32 %v4062_v39, %v1666_v34  ;;  %v1508_v58 = vand.u32 2147483647, %v4116_v3  ;;  %v1758_v16 = vmul.f32 1.442695, %v1740_v0 }
 0x42d   : > { %v1643_v27 = vmul.f32 %v4081_v46, %v1627_v63  ;;  %v1619_v9 = vmul.f32 %v4101_v60, %v1603_v33  ;;  %v1378_v34 = vadd.f32 %v1362_v30, %v1326_v26  ;;  %vm1819_vm3 = vcmp.ge.f32.partialorder %v4009_v53, 0.0 }
 0x42e   : > { %v1706_v8 = vmul.f32 %v4044_v4, %v1690_v52  ;;  %v1698_v48 = vadd.f32 0.2548296, %v1682_v29  ;;  %v1524_v23 = vmul.f32 0.3275911, %v1508_v58  ;;  %v4129_v10 = vpop.eup %2818  ;;  %v1732_v20 = vmul.f32 %v1508_v58, %v1508_v58 }
 0x42f   : > { %v1659_v40 = vadd.f32 -0.28449672, %v1643_v27  ;;  %v1635_v52 = vadd.f32 1.4214138, %v1619_v9  ;;  %v1430_v47 = vadd.f32 %v1414_v59, %v1378_v34  ;;  %v1580_v33 = vmul.f32 1.0614054, %v4129_v10 }
 0x430   : > { %v1786_v56 = vmul.f32 %v2811_v19, %v1706_v8  ;;  %v1714_v4 = vmul.f32 %v4062_v39, %v1698_v48  ;;  %v1540_v0 = vadd.f32 1.0, %v1524_v23  ;;  %v1125_v27 = vadd.f32 %v1109_v6, %v1073_v37 }
 0x431   : > { %v1675_v29 = vmul.f32 %v4081_v46, %v1659_v40  ;;  %v1651_v19 = vmul.f32 %v4101_v60, %v1635_v52  ;;  %v4139_v17 = vadd.f32 %v3938_v28, %v1430_v47  ;;  %v1596_v26 = vadd.f32 -1.4531521, %v1580_v33  ;;  %v2821_v40 = vpop.eup %2820 }
 0x432   : > { %v1802_v63 = vsub.f32 1.0, %v1786_v56  ;;  %v1794_v30 = vmul.f32 %v2813_v31, %v1714_v4  ;;  %2822 = vrcp.f32 %v1540_v0  ;;  %v1161_v48 = vmul.f32 %v3965_v11, %v3804_v43 }
 0x433   : > { %v1691_v59 = vadd.f32 0.2548296, %v1675_v29  ;;  %v1667_v8 = vadd.f32 -0.28449672, %v1651_v19  ;;  %v1612_v58 = vmul.f32 %v4129_v10, %v1596_v26  ;;  %v4148_v47 = vmul.f32 0.70710677, %v4139_v17 }
 0x434   : > { %v1834_v39 = vsub.f32 0.0, %v1802_v63  ;;  %v1810_v49 = vsub.f32 1.0, %v1794_v30  ;;  %2824 = vpow2.f32 %v1758_v16  ;;  %vm1827_vm4 = vcmp.ge.f32.partialorder %v4028_v14, 0.0 }
 0x435   : > { %v1707_v31 = vmul.f32 %v4081_v46, %v1691_v59  ;;  %v1683_v56 = vmul.f32 %v4101_v60, %v1667_v8  ;;  %v1628_v4 = vadd.f32 1.4214138, %v1612_v58  ;;  %v1748_v52 = vsub.f32 0.0, %v1732_v20 }
 0x436   : > { %v1850_v23 = vsel %vm1818_vm1, %v1802_v63, %v1834_v39  ;;  %v1842_v34 = vsub.f32 0.0, %v1810_v49  ;;  %v1501_v42 = vand.u32 2147483647, %v4148_v47  ;;  %v1177_v29 = vadd.f32 %v1161_v48, %v1125_v27 }
 0x437   : > { %v1866_v9 = vadd.f32 1.0, %v1850_v23  ;;  %v1787_v37 = vmul.f32 %v2817_v7, %v1707_v31  ;;  %v1699_v63 = vadd.f32 0.2548296, %v1683_v56  ;;  %v1644_v30 = vmul.f32 %v4129_v10, %v1628_v4  ;;  %v4163_v23 = vld [vmem:[#allocation2 + $0xb0] sm:$0xff] }
 0x438   : > { %v1858_v6 = vsel %vm1826_vm2, %v1810_v49, %v1842_v34  ;;  %v1517_v16 = vmul.f32 0.3275911, %v1501_v42  ;;  %v1725_v19 = vmul.f32 %v1501_v42, %v1501_v42  ;;  %v1213_v20 = vmul.f32 %v3981_v12, %v3808_v51  ;;  %v4178_v42 = vld [vmem:[#allocation2 + $0xb2] sm:$0xff] }
 0x439   : > { %v1882_v46 = vmul.f32 %v1866_v9, %v4034_v24  ;;  %v1874_v33 = vadd.f32 1.0, %v1858_v6  ;;  %v1803_v0 = vsub.f32 1.0, %v1787_v37  ;;  %v1715_v7 = vmul.f32 %v4101_v60, %v1699_v63  ;;  %v4172_v9 = vld [vmem:[#allocation2 + $0xb1] sm:$0xff] }
 0x43a   : > { %v1265_v24 = vmul.f32 %v3991_v35, %v3821_v61  ;;  %v1660_v59 = vadd.f32 -0.28449672, %v1644_v30  ;;  %v1533_v26 = vadd.f32 1.0, %v1517_v16  ;;  %v1774_v8 = vmul.f32 1.442695, %v1748_v52 }
 0x43b   : > { %2512 = vmatprep.mubr.f32.mxu0 %v1882_v46  ;;  %v1890_v25 = vmul.f32 %v1874_v33, %v4039_v1  ;;  %v1835_v39 = vsub.f32 0.0, %v1803_v0  ;;  %v1795_v49 = vmul.f32 %v2821_v40, %v1715_v7  ;;  %v1741_v27 = vsub.f32 0.0, %v1725_v19 }
 0x43c   : > { %v1229_v48 = vadd.f32 %v1213_v20, %v1177_v29  ;;  %v4165_v31 = vpop.eup %2822  ;;  %v1676_v58 = vmul.f32 %v4129_v10, %v1660_v59  ;;  %2826 = vrcp.f32 %v1533_v26  ;;  %v1318_v1 = vmul.f32 %v3823_v62, %v4163_v23 }
 0x43d   : > { %2524 = vmatprep.mubr.f32.mxu1 %v1890_v25  ;;  %v1851_v60 = vsel %vm1819_vm3, %v1803_v0, %v1835_v39  ;;  %v1811_v56 = vsub.f32 1.0, %v1795_v49  ;;  %vm1820_vm5 = vcmp.ge.f32.partialorder %v4056_v45, 0.0  ;;  %v1588_v40 = vmul.f32 1.0614054, %v4165_v31  ;;  %v4746_v45 = vld [vmem:[#allocation41_spill] sm:$0xff] }
 0x43e   : > { %v1867_v34 = vadd.f32 1.0, %v1851_v60  ;;  %v1370_v37 = vmul.f32 %v3838_v5, %v4172_v9  ;;  %v1692_v4 = vadd.f32 0.2548296, %v1676_v58  ;;  %v1760_v53 = vmul.f32 1.442695, %v1741_v27  ;;  %v2825_v6 = vpop.eup %2824 }
 0x43f   : > { %v1281_v52 = vadd.f32 %v1265_v24, %v1229_v48  ;;  %v998_v46 = vmul.f32 %v3850_v13, %v3796_v36  ;;  %v1843_v29 = vsub.f32 0.0, %v1811_v56  ;;  %v1604_v33 = vadd.f32 -1.4531521, %v1588_v40  ;;  %v4742_v40 = vld [vmem:[#allocation35_spill] sm:$0xff] }
 0x440   : > { %v1883_v63 = vmul.f32 %v1867_v34, %v4046_v55  ;;  %v1422_v0 = vmul.f32 %v3834_v2, %v4178_v42  ;;  %v1708_v30 = vmul.f32 %v4129_v10, %v1692_v4  ;;  %v1050_v7 = vmul.f32 %v3864_v22, %v3798_v38 }
 0x441   : > { %v1334_v16 = vadd.f32 %v1318_v1, %v1281_v52  ;;  %v1102_v19 = vmul.f32 %v3854_v15, %v3800_v41  ;;  %v1859_v13 = vsel %vm1827_vm4, %v1811_v56, %v1843_v29  ;;  %v1620_v55 = vmul.f32 %v4165_v31, %v1604_v33 }
 0x442   : > { %2513 = vmatmul.mubr.f32.vlgmr.msra.gmra.mrb[0].mxu0 %v1883_v63  ;;  %2828 = vpow2.f32 %v1774_v8  ;;  %v1154_v20 = vmul.f32 %v4003_v18, %v3804_v43  ;;  %v1875_v24 = vadd.f32 1.0, %v1859_v13  ;;  %v1788_v25 = vmul.f32 %v2825_v6, %v1708_v30  ;;  %v4744_v63 = vld [vmem:[#allocation31_spill] sm:$0xff]  ;;  %v4745_v13 = vld [vmem:[#allocation32_spill] sm:$0xff] }
 0x443   : > { %v1386_v10 = vadd.f32 %v1370_v37, %v1334_v16  ;;  %v1066_v39 = vadd.f32 %v1050_v7, %v998_v46  ;;  %v1636_v59 = vadd.f32 1.4214138, %v1620_v55  ;;  %2830 = vpow2.f32 %v1760_v53 }
 0x444   : > { %v1206_v22 = vmul.f32 %v4007_v21, %v3808_v51  ;;  %v1258_v15 = vmul.f32 %v4014_v54, %v3821_v61  ;;  %v1891_v14 = vmul.f32 %v1875_v24, %v4089_v50  ;;  %v1804_v26 = vsub.f32 1.0, %v1788_v25  ;;  %v4747_v25 = vld [vmem:[#allocation47_spill] sm:$0xff] }
 0x445   : > { %v1438_v49 = vadd.f32 %v1422_v0, %v1386_v10  ;;  %v1118_v8 = vadd.f32 %v1102_v19, %v1066_v39  ;;  %v1652_v27 = vmul.f32 %v4165_v31, %v1636_v59  ;;  %v1311_v48 = vmul.f32 %v3823_v62, %v3815_v57 }
 0x446   : > { %v1006_v60 = vmul.f32 %v3881_v32, %v3796_v36  ;;  %v1058_v58 = vmul.f32 %v3893_v44, %v3798_v38  ;;  %v4207_v1 = vpop.eup %2826  ;;  %2525 = vmatmul.mubr.f32.vlgmr.msra.gmra.mrb[0].mxu1 %v1891_v14  ;;  %v1836_v34 = vsub.f32 0.0, %v1804_v26  ;;  %v1110_v37 = vmul.f32 %v4742_v40, %v3800_v41  ;;  %v4743_v32 = vld [vmem:[#allocation40_spill] sm:$0xff] }
 0x447   : > { %v4210_v50 = vadd.f32 %v3938_v28, %v1438_v49  ;;  %v1170_v56 = vadd.f32 %v1154_v20, %v1118_v8  ;;  %v1668_v4 = vadd.f32 -0.28449672, %v1652_v27  ;;  %v1581_v57 = vmul.f32 1.0614054, %v4207_v1  ;;  %v4748_v8 = vld [vmem:[#allocation42_spill] sm:$0xff] }
 0x448   : > { %v1074_v53 = vadd.f32 %v1058_v58, %v1006_v60  ;;  %v1162_v52 = vmul.f32 %v4743_v32, %v3804_v43  ;;  %v1852_v44 = vsel %vm1820_vm5, %v1804_v26, %v1836_v34  ;;  %v1363_v29 = vmul.f32 %v3838_v5, %v4744_v63  ;;  %v4244_v63 = vld [vmem:[#allocation2 + $0xc2] sm:$0xff] }
 0x449   : > { %v4220_v46 = vmul.f32 0.70710677, %v4210_v50  ;;  %v1222_v6 = vadd.f32 %v1206_v22, %v1170_v56  ;;  %v1868_v33 = vadd.f32 1.0, %v1852_v44  ;;  %v1684_v0 = vmul.f32 %v4165_v31, %v1668_v4 }
 0x44a   : > { %v1597_v30 = vadd.f32 -1.4531521, %v1581_v57  ;;  %v1126_v16 = vadd.f32 %v1110_v37, %v1074_v53  ;;  %v1415_v55 = vmul.f32 %v3834_v2, %v4745_v13  ;;  %v1214_v20 = vmul.f32 %v4746_v45, %v3808_v51  ;;  %v4239_v53 = vld [vmem:[#allocation2 + $0xc1] sm:$0xff] }
 0x44b   : > { %v1509_v7 = vand.u32 2147483647, %v4220_v46  ;;  %v1274_v19 = vadd.f32 %v1258_v15, %v1222_v6  ;;  %v1884_v10 = vmul.f32 %v1868_v33, %v4747_v25  ;;  %v1700_v39 = vadd.f32 0.2548296, %v1684_v0  ;;  %v4234_v15 = vld [vmem:[#allocation2 + $0xc0] sm:$0xff]  ;;  %v4752_v25 = vld [vmem:[#allocation43_spill] sm:$0xff] }
 0x44c   : > { %v2829_v24 = vpop.eup %2828  ;;  %v1613_v59 = vmul.f32 %v4207_v1, %v1597_v30  ;;  %v1178_v22 = vadd.f32 %v1162_v52, %v1126_v16  ;;  %v1266_v27 = vmul.f32 %v4748_v8, %v3821_v61  ;;  %v1319_v40 = vmul.f32 %v3823_v62, %v4234_v15  ;;  %v4749_v0 = vld [vmem:[#allocation37_spill] sm:$0xff] }
 0x44d   : > { %v1525_v14 = vmul.f32 0.3275911, %v1509_v7  ;;  %v1733_v26 = vmul.f32 %v1509_v7, %v1509_v7  ;;  %v1327_v49 = vadd.f32 %v1311_v48, %v1274_v19  ;;  %v2831_v60 = vpop.eup %2830  ;;  %2515 = vmatprep.mubr.f32.mxu0 %v1884_v10  ;;  %v1716_v58 = vmul.f32 %v4165_v31, %v1700_v39  ;;  %v4750_v19 = vld [vmem:[#allocation38_spill] sm:$0xff] }
 0x44e   : > { %v1629_v34 = vadd.f32 1.4214138, %v1613_v59  ;;  %v1230_v56 = vadd.f32 %v1214_v20, %v1178_v22  ;;  %v1371_v6 = vmul.f32 %v3838_v5, %v4239_v53  ;;  %v1423_v33 = vmul.f32 %v3834_v2, %v4244_v63 }
 0x44f   : > { %v1541_v37 = vadd.f32 1.0, %v1525_v14  ;;  %v1749_v4 = vsub.f32 0.0, %v1733_v26  ;;  %v1379_v57 = vadd.f32 %v1363_v29, %v1327_v49  ;;  %v1796_v48 = vmul.f32 %v2829_v24, %v1716_v58  ;;  %v4751_v24 = vld [vmem:[#allocation39_spill] sm:$0xff]  ;;  %v4753_v26 = vld [vmem:[#allocation44_spill] sm:$0xff] }
 0x450   : > { %v1645_v52 = vmul.f32 %v4207_v1, %v1629_v34  ;;  %v1282_v44 = vadd.f32 %v1266_v27, %v1230_v56  ;;  %v999_v30 = vmul.f32 %v4749_v0, %v3796_v36  ;;  %v1051_v13 = vmul.f32 %v4750_v19, %v3798_v38 }
 0x451   : > { %2832 = vrcp.f32 %v1541_v37  ;;  %v1431_v31 = vadd.f32 %v1415_v55, %v1379_v57  ;;  %v1812_v29 = vsub.f32 1.0, %v1796_v48  ;;  %vm1828_vm6 = vcmp.ge.f32.partialorder %v4116_v3, 0.0  ;;  %v4754_v3 = vld [vmem:[#allocation45_spill] sm:$0xff] }
 0x452   : > { %v1661_v16 = vadd.f32 -0.28449672, %v1645_v52  ;;  %v1335_v7 = vadd.f32 %v1319_v40, %v1282_v44  ;;  %v1103_v55 = vmul.f32 %v4751_v24, %v3800_v41  ;;  %v1155_v10 = vmul.f32 %v4752_v25, %v3804_v43  ;;  %v4756_v24 = vld [vmem:[#allocation33_spill] sm:$0xff] }
 0x453   : > { %v4254_v20 = vadd.f32 %v3938_v28, %v1431_v31  ;;  %v1844_v39 = vsub.f32 0.0, %v1812_v29  ;;  %v1067_v14 = vadd.f32 %v1051_v13, %v999_v30  ;;  %v1476_v49 = vmul.f32 0.5, %v4753_v26 }
 0x454   : > { %v1677_v59 = vmul.f32 %v4207_v1, %v1661_v16  ;;  %v1387_v22 = vadd.f32 %v1371_v6, %v1335_v7  ;;  %v1776_v27 = vmul.f32 1.442695, %v1749_v4  ;;  %v1207_v34 = vmul.f32 %v4754_v3, %v3808_v51 }
 0x455   : > { %v4263_v58 = vmul.f32 0.70710677, %v4254_v20  ;;  %v1860_v56 = vsel %vm1828_vm6, %v1812_v29, %v1844_v39  ;;  %v1119_v57 = vadd.f32 %v1103_v55, %v1067_v14  ;;  %v1469_v52 = vmul.f32 0.5, %v4139_v17  ;;  %v4755_v29 = vld [vmem:[#allocation46_spill] sm:$0xff] }
 0x456   : > { %v1693_v40 = vadd.f32 0.2548296, %v1677_v59  ;;  %v1439_v37 = vadd.f32 %v1423_v33, %v1387_v22  ;;  %v1876_v48 = vadd.f32 1.0, %v1860_v56  ;;  %vm1821_vm7 = vcmp.ge.f32.partialorder %v4148_v47, 0.0  ;;  %v4757_v14 = vld [vmem:[#allocation34_spill] sm:$0xff] }
 0x457   : > { %v1502_v44 = vand.u32 2147483647, %v4263_v58  ;;  %v1171_v31 = vadd.f32 %v1155_v10, %v1119_v57  ;;  %v1259_v33 = vmul.f32 %v4755_v29, %v3821_v61  ;;  %2834 = vpow2.f32 %v1776_v27 }
 0x458   : > { %v1709_v6 = vmul.f32 %v4207_v1, %v1693_v40  ;;  %v4272_v4 = vadd.f32 %v3938_v28, %v1439_v37  ;;  %v1892_v0 = vmul.f32 %v1876_v48, %v1476_v49  ;;  %v1312_v55 = vmul.f32 %v3823_v62, %v4756_v24  ;;  %v4758_v48 = vld [vmem:[#allocation36_spill] sm:$0xff] }
 0x459   : > { %v1518_v30 = vmul.f32 0.3275911, %v1502_v44  ;;  %v1726_v16 = vmul.f32 %v1502_v44, %v1502_v44  ;;  %v1223_v19 = vadd.f32 %v1207_v34, %v1171_v31  ;;  %v1007_v10 = vmul.f32 %v3965_v11, %v3796_v36 }
 0x45a   : > { %v1789_v7 = vmul.f32 %v2831_v60, %v1709_v6  ;;  %v4277_v17 = vmul.f32 0.70710677, %v4272_v4  ;;  %2527 = vmatprep.mubr.f32.mxu1 %v1892_v0  ;;  %v1059_v39 = vmul.f32 %v3981_v12, %v3798_v38  ;;  %v1364_v26 = vmul.f32 %v3838_v5, %v4757_v14 }
 0x45b   : > { %v4279_v13 = vpop.eup %2832  ;;  %v1534_v1 = vadd.f32 1.0, %v1518_v30  ;;  %v1742_v49 = vsub.f32 0.0, %v1726_v16  ;;  %v1275_v27 = vadd.f32 %v1259_v33, %v1223_v19  ;;  %v1416_v12 = vmul.f32 %v3834_v2, %v4758_v48 }
 0x45c   : > { %v1805_v59 = vsub.f32 1.0, %v1789_v7  ;;  %v1589_v60 = vmul.f32 1.0614054, %v4279_v13  ;;  %v1510_v22 = vand.u32 2147483647, %v4277_v17  ;;  %v1075_v34 = vadd.f32 %v1059_v39, %v1007_v10  ;;  %v4304_v39 = vld [vmem:[#allocation2 + $0xc8] sm:$0xff] }
 0x45d   : > { %2836 = vrcp.f32 %v1534_v1  ;;  %v1328_v11 = vadd.f32 %v1312_v55, %v1275_v27  ;;  %v1111_v44 = vmul.f32 %v3991_v35, %v3800_v41  ;;  %v1163_v6 = vmul.f32 %v4163_v23, %v3804_v43  ;;  %v4312_v27 = vld [vmem:[#allocation2 + $0xc9] sm:$0xff] }
 0x45e   : > { %v1837_v56 = vsub.f32 0.0, %v1805_v59  ;;  %v1605_v40 = vadd.f32 -1.4531521, %v1589_v60  ;;  %v1526_v37 = vmul.f32 0.3275911, %v1510_v22  ;;  %v1734_v57 = vmul.f32 %v1510_v22, %v1510_v22 }
 0x45f   : > { %v1380_v7 = vadd.f32 %v1364_v26, %v1328_v11  ;;  %v1127_v19 = vadd.f32 %v1111_v44, %v1075_v34  ;;  %v1215_v1 = vmul.f32 %v4172_v9, %v3808_v51  ;;  %v1762_v24 = vmul.f32 1.442695, %v1742_v49  ;;  %v1136_v26 = vld [vmem:[#allocation2 + $0x60] sm:$0xff] }
 0x460   : > { %v1853_v31 = vsel %vm1821_vm7, %v1805_v59, %v1837_v56  ;;  %v1621_v0 = vmul.f32 %v4279_v13, %v1605_v40  ;;  %v1542_v30 = vadd.f32 1.0, %v1526_v37  ;;  %v1750_v16 = vsub.f32 0.0, %v1734_v57 }
 0x461   : > { %v1869_v33 = vadd.f32 1.0, %v1853_v31  ;;  %v1432_v55 = vadd.f32 %v1416_v12, %v1380_v7  ;;  %v1179_v10 = vadd.f32 %v1163_v6, %v1127_v19  ;;  %v1267_v47 = vmul.f32 %v4178_v42, %v3821_v61  ;;  %v2835_v59 = vpop.eup %2834  ;;  %v1188_v6 = vld [vmem:[#allocation2 + $0x61] sm:$0xff] }
 0x462   : > { %v1637_v2 = vadd.f32 1.4214138, %v1621_v0  ;;  %2838 = vrcp.f32 %v1542_v30  ;;  %v1778_v22 = vmul.f32 1.442695, %v1750_v16  ;;  %v1320_v14 = vmul.f32 %v3823_v62, %v4304_v39  ;;  %v1240_v31 = vld [vmem:[#allocation2 + $0x62] sm:$0xff]  ;;  %v4330_v30 = vld [vmem:[#allocation2 + $0xca] sm:$0xff] }
 0x463   : > { %v1885_v35 = vmul.f32 %v1869_v33, %v1469_v52  ;;  %v4310_v49 = vadd.f32 %v3938_v28, %v1432_v55  ;;  %v1231_v52 = vadd.f32 %v1215_v1, %v1179_v10  ;;  %v1000_v34 = vmul.f32 %v4003_v18, %v3796_v36  ;;  %v1293_v16 = vld [vmem:[#allocation2 + $0x78] sm:$0xff]  ;;  %v4337_v7 = vld [vmem:[%s4723_s5 + $0x8] ss:$0 sm:$0xff] }
 0x464   : > { %v1653_v60 = vmul.f32 %v4279_v13, %v1637_v2  ;;  %v1052_v56 = vmul.f32 %v4007_v21, %v3798_v38  ;;  %2840 = vpow2.f32 %v1762_v24  ;;  %v1372_v37 = vmul.f32 %v3838_v5, %v4312_v27 }
 0x465   : > { %2516 = vmatmul.mubr.f32.gmra.mrb[2].mxu0 %v1885_v35  ;;  %v1104_v57 = vmul.f32 %v4014_v54, %v3800_v41  ;;  %v4325_v48 = vmul.f32 0.70710677, %v4310_v49  ;;  %v1283_v12 = vadd.f32 %v1267_v47, %v1231_v52  ;;  %v1156_v18 = vmul.f32 %v3804_v43, %v1136_v26 }
 0x466   : > { %v1669_v40 = vadd.f32 -0.28449672, %v1653_v60  ;;  %v1068_v44 = vadd.f32 %v1052_v56, %v1000_v34  ;;  %2842 = vpow2.f32 %v1778_v22  ;;  %vm1829_vm8 = vcmp.ge.f32.partialorder %v4220_v46, 0.0  ;;  %v1345_v34 = vld [vmem:[#allocation2 + $0x79] sm:$0xff] }
 0x467   : > { %v4322_v11 = vpop.eup %2836  ;;  %v1503_v54 = vand.u32 2147483647, %v4325_v48  ;;  %v1336_v33 = vadd.f32 %v1320_v14, %v1283_v12  ;;  %v1424_v19 = vmul.f32 %v4337_v7, %v4330_v30  ;;  %v1208_v35 = vmul.f32 %v3808_v51, %v1188_v6 }
 0x468   : > { %v1685_v21 = vmul.f32 %v4279_v13, %v1669_v40  ;;  %v1582_v0 = vmul.f32 1.0614054, %v4322_v11  ;;  %v1120_v1 = vadd.f32 %v1104_v57, %v1068_v44  ;;  %v1260_v55 = vmul.f32 %v3821_v61, %v1240_v31 }
 0x469   : > { %v1519_v10 = vmul.f32 0.3275911, %v1503_v54  ;;  %v1388_v47 = vadd.f32 %v1372_v37, %v1336_v33  ;;  %v1313_v22 = vmul.f32 %v3823_v62, %v1293_v16  ;;  %v1008_v56 = vmul.f32 %v4743_v32, %v3796_v36 }
 0x46a   : > { %v1701_v2 = vadd.f32 0.2548296, %v1685_v21  ;;  %v1598_v24 = vadd.f32 -1.4531521, %v1582_v0  ;;  %v1172_v60 = vadd.f32 %v1156_v18, %v1120_v1  ;;  %v1060_v40 = vmul.f32 %v4746_v45, %v3798_v38  ;;  %v1397_v21 = vld [vmem:[#allocation2 + $0x7a] sm:$0xff] }
 0x46b   : > { %v1535_v12 = vadd.f32 1.0, %v1519_v10  ;;  %v1727_v37 = vmul.f32 %v1503_v54, %v1503_v54  ;;  %v1440_v44 = vadd.f32 %v1424_v19, %v1388_v47  ;;  %v1365_v32 = vmul.f32 %v3838_v5, %v1345_v34 }
 0x46c   : > { %v4344_v14 = vpop.eup %2838  ;;  %v1717_v26 = vmul.f32 %v4279_v13, %v1701_v2  ;;  %v1614_v52 = vmul.f32 %v4322_v11, %v1598_v24  ;;  %v1224_v31 = vadd.f32 %v1208_v35, %v1172_v60  ;;  %v1076_v0 = vadd.f32 %v1060_v40, %v1008_v56 }
 0x46d   : > { %v1590_v57 = vmul.f32 1.0614054, %v4344_v14  ;;  %2844 = vrcp.f32 %v1535_v12  ;;  %v4354_v16 = vadd.f32 %v3938_v28, %v1440_v44  ;;  %v1112_v54 = vmul.f32 %v4748_v8, %v3800_v41 }
 0x46e   : > { %v1797_v18 = vmul.f32 %v2835_v59, %v1717_v26  ;;  %v1630_v6 = vadd.f32 1.4214138, %v1614_v52  ;;  %v2841_v33 = vpop.eup %2840  ;;  %v1276_v2 = vadd.f32 %v1260_v55, %v1224_v31  ;;  %v1743_v19 = vsub.f32 0.0, %v1727_v37 }
 0x46f   : > { %v1606_v13 = vadd.f32 -1.4531521, %v1590_v57  ;;  %v4362_v24 = vmul.f32 0.70710677, %v4354_v16  ;;  %v1417_v35 = vmul.f32 %v4337_v7, %v1397_v21  ;;  %v1128_v26 = vadd.f32 %v1112_v54, %v1076_v0  ;;  %v1301_v21 = vld [vmem:[#allocation2 + $0xd8] sm:$0xff] }
 0x470   : > { %v1813_v1 = vsub.f32 1.0, %v1797_v18  ;;  %v1646_v45 = vmul.f32 %v4322_v11, %v1630_v6  ;;  %v2843_v28 = vpop.eup %2842  ;;  %v1329_v60 = vadd.f32 %v1313_v22, %v1276_v2  ;;  %v1477_v52 = vmul.f32 0.5, %v4210_v50  ;;  %v1353_v54 = vld [vmem:[#allocation2 + $0xd9] sm:$0xff] }
 0x471   : > { %v1622_v59 = vmul.f32 %v4344_v14, %v1606_v13  ;;  %v1511_v55 = vand.u32 2147483647, %v4362_v24  ;;  %v1164_v8 = vmul.f32 %v4234_v15, %v3804_v43  ;;  %v1216_v12 = vmul.f32 %v4239_v53, %v3808_v51  ;;  %v4382_v53 = vld [vmem:[%s4732_s7] ss:$0 sm:$0xff] }
 0x472   : > { %v1845_v10 = vsub.f32 0.0, %v1813_v1  ;;  %v1662_v47 = vadd.f32 -0.28449672, %v1646_v45  ;;  %v1381_v57 = vadd.f32 %v1365_v32, %v1329_v60  ;;  %v1764_v18 = vmul.f32 1.442695, %v1743_v19 }
 0x473   : > { %v1638_v34 = vadd.f32 1.4214138, %v1622_v59  ;;  %v1527_v44 = vmul.f32 0.3275911, %v1511_v55  ;;  %v1180_v31 = vadd.f32 %v1164_v8, %v1128_v26  ;;  %v1268_v46 = vmul.f32 %v4244_v63, %v3821_v61 }
 0x474   : > { %v1861_v56 = vsel %vm1829_vm8, %v1813_v1, %v1845_v10  ;;  %v1678_v40 = vmul.f32 %v4322_v11, %v1662_v47  ;;  %v1433_v6 = vadd.f32 %v1417_v35, %v1381_v57  ;;  %v1470_v32 = vmul.f32 0.5, %v4254_v20 }
 0x475   : > { %v1877_v37 = vadd.f32 1.0, %v1861_v56  ;;  %v1654_v22 = vmul.f32 %v4344_v14, %v1638_v34  ;;  %v1543_v13 = vadd.f32 1.0, %v1527_v44  ;;  %v1232_v2 = vadd.f32 %v1216_v12, %v1180_v31 }
 0x476   : > { %v1694_v50 = vadd.f32 0.2548296, %v1678_v40  ;;  %v4385_v45 = vadd.f32 %v4382_v53, %v1433_v6  ;;  %vm1822_vm9 = vcmp.ge.f32.partialorder %v4263_v58, 0.0  ;;  %v1321_v20 = vmul.f32 %v3823_v62, %v1301_v21 }
 0x477   : > { %v1893_v0 = vmul.f32 %v1877_v37, %v1477_v52  ;;  %v1670_v15 = vadd.f32 -0.28449672, %v1654_v22  ;;  %v4387_v59 = vpop.eup %2844  ;;  %2846 = vrcp.f32 %v1543_v13  ;;  %v1735_v10 = vmul.f32 %v1511_v55, %v1511_v55 }
 0x478   : > { %v1710_v1 = vmul.f32 %v4322_v11, %v1694_v50  ;;  %v1405_v11 = vld [vmem:[#allocation2 + $0xda] sm:$0xff]  ;;  %v1583_v35 = vmul.f32 1.0614054, %v4387_v59  ;;  %v4394_v47 = vmul.f32 0.70710677, %v4385_v45  ;;  %2848 = vpow2.f32 %v1764_v18 }
 0x479   : > { %2528 = vmatmul.mubr.f32.gmra.mrb[2].mxu1 %v1893_v0  ;;  %v1686_v63 = vmul.f32 %v4344_v14, %v1670_v15  ;;  %v1284_v26 = vadd.f32 %v1268_v46, %v1232_v2  ;;  %v1373_v52 = vmul.f32 %v3838_v5, %v1353_v54  ;;  %v1425_v40 = vmul.f32 %v4337_v7, %v1405_v11  ;;  %v1137_v0 = vld [vmem:[#allocation2 + $0x68] sm:$0xff] }
 0x47a   : > { %v1790_v19 = vmul.f32 %v2841_v33, %v1710_v1  ;;  %v1599_v8 = vadd.f32 -1.4531521, %v1583_v35  ;;  %v1504_v56 = vand.u32 2147483647, %v4394_v47  ;;  %v1001_v55 = vmul.f32 %v4752_v25, %v3796_v36 }
 0x47b   : > { %v1702_v60 = vadd.f32 0.2548296, %v1686_v63  ;;  %v1337_v33 = vadd.f32 %v1321_v20, %v1284_v26  ;;  %v1053_v12 = vmul.f32 %v4754_v3, %v3798_v38  ;;  %v1751_v44 = vsub.f32 0.0, %v1735_v10  ;;  %v1189_v3 = vld [vmem:[#allocation2 + $0x69] sm:$0xff]  ;;  %v1294_v10 = vld [vmem:[#allocation2 + $0x80] sm:$0xff] }
 0x47c   : > { %v1806_v34 = vsub.f32 1.0, %v1790_v19  ;;  %v1615_v22 = vmul.f32 %v4387_v59, %v1599_v8  ;;  %v1520_v50 = vmul.f32 0.3275911, %v1504_v56  ;;  %v1105_v21 = vmul.f32 %v4755_v29, %v3800_v41  ;;  %v1241_v29 = vld [vmem:[#allocation2 + $0x6a] sm:$0xff]  ;;  %v1346_v8 = vld [vmem:[#allocation2 + $0x81] sm:$0xff] }
 0x47d   : > { %v1718_v57 = vmul.f32 %v4344_v14, %v1702_v60  ;;  %v1389_v6 = vadd.f32 %v1373_v52, %v1337_v33  ;;  %v1069_v31 = vadd.f32 %v1053_v12, %v1001_v55  ;;  %vm1830_vm10 = vcmp.ge.f32.partialorder %v4277_v17, 0.0 }
 0x47e   : > { %v1838_v37 = vsub.f32 0.0, %v1806_v34  ;;  %v1631_v25 = vadd.f32 1.4214138, %v1615_v22  ;;  %v1536_v15 = vadd.f32 1.0, %v1520_v50  ;;  %v1780_v54 = vmul.f32 1.442695, %v1751_v44 }
 0x47f   : > { %v1798_v18 = vmul.f32 %v2843_v28, %v1718_v57  ;;  %v1441_v1 = vadd.f32 %v1425_v40, %v1389_v6  ;;  %v1121_v2 = vadd.f32 %v1105_v21, %v1069_v31  ;;  %v1157_v63 = vmul.f32 %v3804_v43, %v1137_v0  ;;  %v1398_v44 = vld [vmem:[#allocation2 + $0x82] sm:$0xff] }
 0x480   : > { %v1854_v14 = vsel %vm1822_vm9, %v1806_v34, %v1838_v37  ;;  %v1647_v28 = vmul.f32 %v4387_v59, %v1631_v25  ;;  %2850 = vrcp.f32 %v1536_v15  ;;  %v1209_v35 = vmul.f32 %v3808_v51, %v1189_v3 }
 0x481   : > { %v1870_v13 = vadd.f32 1.0, %v1854_v14  ;;  %v1814_v46 = vsub.f32 1.0, %v1798_v18  ;;  %v4412_v20 = vpop.eup %2846  ;;  %v4415_v19 = vadd.f32 %v4382_v53, %v1441_v1  ;;  %v1478_v60 = vmul.f32 0.5, %v4272_v4 }
 0x482   : > { %v1663_v26 = vadd.f32 -0.28449672, %v1647_v28  ;;  %v1591_v52 = vmul.f32 1.0614054, %v4412_v20  ;;  %v1173_v34 = vadd.f32 %v1157_v63, %v1121_v2  ;;  %v2849_v40 = vpop.eup %2848  ;;  %v1261_v55 = vmul.f32 %v3821_v61, %v1241_v29 }
 0x483   : > { %v1886_v58 = vmul.f32 %v1870_v13, %v1470_v32  ;;  %v1846_v11 = vsub.f32 0.0, %v1814_v46  ;;  %v1728_v32 = vmul.f32 %v1504_v56, %v1504_v56  ;;  %v4423_v33 = vmul.f32 0.70710677, %v4415_v19 }
 0x484   : > { %v1679_v37 = vmul.f32 %v4387_v59, %v1663_v26  ;;  %v1607_v4 = vadd.f32 -1.4531521, %v1591_v52  ;;  %v1225_v22 = vadd.f32 %v1209_v35, %v1173_v34  ;;  %2852 = vpow2.f32 %v1780_v54  ;;  %v1302_v34 = vld [vmem:[#allocation2 + $0xe0] sm:$0xff] }
 0x485   : > { %2518 = vmatprep.mubr.f32.mxu0 %v1886_v58  ;;  %v1862_v57 = vsel %vm1830_vm10, %v1814_v46, %v1846_v11  ;;  %v1512_v50 = vand.u32 2147483647, %v4423_v33  ;;  %v1314_v18 = vmul.f32 %v3823_v62, %v1294_v10  ;;  %v1366_v17 = vmul.f32 %v3838_v5, %v1346_v8 }
 0x486   : > { %v1878_v12 = vadd.f32 1.0, %v1862_v57  ;;  %v1695_v56 = vadd.f32 0.2548296, %v1679_v37  ;;  %v1623_v31 = vmul.f32 %v4412_v20, %v1607_v4  ;;  %v1277_v21 = vadd.f32 %v1261_v55, %v1225_v22 }
 0x487   : > { %v1744_v0 = vsub.f32 0.0, %v1728_v32  ;;  %v1528_v14 = vmul.f32 0.3275911, %v1512_v50  ;;  %v1418_v25 = vmul.f32 %v4337_v7, %v1398_v44  ;;  %v1009_v15 = vmul.f32 %v4163_v23, %v3796_v36 }
 0x488   : > { %v1894_v6 = vmul.f32 %v1878_v12, %v1478_v60  ;;  %v1711_v3 = vmul.f32 %v4387_v59, %v1695_v56  ;;  %v1639_v13 = vadd.f32 1.4214138, %v1623_v31  ;;  %v1330_v46 = vadd.f32 %v1314_v18, %v1277_v21  ;;  %v1406_v18 = vld [vmem:[#allocation2 + $0xe2] sm:$0xff] }
 0x489   : > { %v1061_v1 = vmul.f32 %v4172_v9, %v3798_v38  ;;  %v1544_v2 = vadd.f32 1.0, %v1528_v14  ;;  %v1113_v28 = vmul.f32 %v4178_v42, %v3800_v41  ;;  %v1165_v54 = vmul.f32 %v4304_v39, %v3804_v43 }
 0x48a   : > { %2530 = vmatprep.mubr.f32.mxu1 %v1894_v6  ;;  %v4441_v63 = vpop.eup %2850  ;;  %v1791_v29 = vmul.f32 %v2849_v40, %v1711_v3  ;;  %v1655_v36 = vmul.f32 %v4412_v20, %v1639_v13  ;;  %v1382_v23 = vadd.f32 %v1366_v17, %v1330_v46  ;;  %v1766_v11 = vmul.f32 1.442695, %v1744_v0 }
 0x48b   : > { %v1077_v58 = vadd.f32 %v1061_v1, %v1009_v15  ;;  %v1584_v59 = vmul.f32 1.0614054, %v4441_v63  ;;  %2854 = vrcp.f32 %v1544_v2  ;;  %vm1823_vm11 = vcmp.ge.f32.partialorder %v4325_v48, 0.0 }
 0x48c   : > { %v1807_v35 = vsub.f32 1.0, %v1791_v29  ;;  %v1671_v38 = vadd.f32 -0.28449672, %v1655_v36  ;;  %v1434_v9 = vadd.f32 %v1418_v25, %v1382_v23  ;;  %v1736_v42 = vmul.f32 %v1512_v50, %v1512_v50 }
 0x48d   : > { %v1129_v10 = vadd.f32 %v1113_v28, %v1077_v58  ;;  %v1600_v41 = vadd.f32 -1.4531521, %v1584_v59  ;;  %v1217_v43 = vmul.f32 %v4312_v27, %v3808_v51  ;;  %v1471_v40 = vmul.f32 0.5, %v4310_v49  ;;  %v1354_v27 = vld [vmem:[#allocation2 + $0xe1] sm:$0xff] }
 0x48e   : > { %v1839_v39 = vsub.f32 0.0, %v1807_v35  ;;  %v1687_v60 = vmul.f32 %v4412_v20, %v1671_v38  ;;  %v4450_v26 = vadd.f32 %v4382_v53, %v1434_v9  ;;  %v2853_v8 = vpop.eup %2852  ;;  %v1269_v48 = vmul.f32 %v4330_v30, %v3821_v61 }
 0x48f   : > { %v1181_v52 = vadd.f32 %v1165_v54, %v1129_v10  ;;  %v1616_v57 = vmul.f32 %v4441_v63, %v1600_v41  ;;  %2856 = vpow2.f32 %v1766_v11  ;;  %v1322_v22 = vmul.f32 %v3823_v62, %v1302_v34 }
 0x490   : > { %v1855_v32 = vsel %vm1823_vm11, %v1807_v35, %v1839_v39  ;;  %v1703_v55 = vadd.f32 0.2548296, %v1687_v60  ;;  %v4457_v51 = vmul.f32 0.70710677, %v4450_v26  ;;  %v1752_v49 = vsub.f32 0.0, %v1736_v42 }
 0x491   : > { %v1871_v12 = vadd.f32 1.0, %v1855_v32  ;;  %v1632_v37 = vadd.f32 1.4214138, %v1616_v57  ;;  %v1233_v4 = vadd.f32 %v1217_v43, %v1181_v52  ;;  %v1374_v6 = vmul.f32 %v3838_v5, %v1354_v27 }
 0x492   : > { %v1719_v44 = vmul.f32 %v4412_v20, %v1703_v55  ;;  %v1505_v50 = vand.u32 2147483647, %v4457_v51  ;;  %v1426_v62 = vmul.f32 %v4337_v7, %v1406_v18  ;;  %vm1831_vm12 = vcmp.ge.f32.partialorder %v4362_v24, 0.0 }
 0x493   : > { %v1887_v17 = vmul.f32 %v1871_v12, %v1471_v40  ;;  %v1648_v61 = vmul.f32 %v4441_v63, %v1632_v37  ;;  %v1285_v30 = vadd.f32 %v1269_v48, %v1233_v4  ;;  %v1782_v13 = vmul.f32 1.442695, %v1752_v49 }
 0x494   : > { %v1799_v56 = vmul.f32 %v2853_v8, %v1719_v44  ;;  %v1521_v31 = vmul.f32 0.3275911, %v1505_v50  ;;  %v1479_v5 = vmul.f32 0.5, %v4354_v16  ;;  %v1729_v11 = vmul.f32 %v1505_v50, %v1505_v50 }
 0x495   : > { %v2855_v21 = vpop.eup %2854  ;;  %2519 = vmatmul.mubr.f32.gmra.mrb[4].mxu0 %v1887_v17  ;;  %v1664_v0 = vadd.f32 -0.28449672, %v1648_v61  ;;  %v1338_v14 = vadd.f32 %v1322_v22, %v1285_v30  ;;  %vm1824_vm13 = vcmp.ge.f32.partialorder %v4394_v47, 0.0  ;;  %v1472_v60 = vmul.f32 0.5, %v4385_v45 }
 0x496   : > { %v1815_v25 = vsub.f32 1.0, %v1799_v56  ;;  %v1592_v20 = vmul.f32 1.0614054, %v2855_v21  ;;  %v1537_v15 = vadd.f32 1.0, %v1521_v31  ;;  %vm1832_vm14 = vcmp.ge.f32.partialorder %v4423_v33, 0.0 }
 0x497   : > { %v1680_v3 = vmul.f32 %v4441_v63, %v1664_v0  ;;  %v1390_v46 = vadd.f32 %v1374_v6, %v1338_v14  ;;  %v1480_v18 = vmul.f32 0.5, %v4415_v19  ;;  %vm1825_vm15 = vcmp.ge.f32.partialorder %v4457_v51, 0.0 }
 0x498   : > { %v1847_v1 = vsub.f32 0.0, %v1815_v25  ;;  %v1608_v2 = vadd.f32 -1.4531521, %v1592_v20  ;;  %2858 = vrcp.f32 %v1537_v15 }
 0x499   : > { %v1696_v28 = vadd.f32 0.2548296, %v1680_v3  ;;  %v1442_v54 = vadd.f32 %v1426_v62, %v1390_v46  ;;  %v2857_v29 = vpop.eup %2856  ;;  %2860 = vpow2.f32 %v1782_v13 }
 0x49a   : > { %v1863_v36 = vsel %vm1831_vm12, %v1815_v25, %v1847_v1  ;;  %v1624_v23 = vmul.f32 %v2855_v21, %v1608_v2  ;;  %v1473_v2 = vmul.f32 0.5, %v4450_v26 }
 0x49b   : > { %v1879_v7 = vadd.f32 1.0, %v1863_v36  ;;  %v1712_v58 = vmul.f32 %v4441_v63, %v1696_v28  ;;  %v4470_v24 = vadd.f32 %v4382_v53, %v1442_v54  ;;  %v1745_v63 = vsub.f32 0.0, %v1729_v11 }
 0x49c   : > { %v1640_v59 = vadd.f32 1.4214138, %v1624_v23 }
 0x49d   : > { %v1895_v35 = vmul.f32 %v1879_v7, %v1479_v5  ;;  %v1792_v38 = vmul.f32 %v2857_v29, %v1712_v58  ;;  %v4473_v9 = vmul.f32 0.70710677, %v4470_v24  ;;  %v1768_v32 = vmul.f32 1.442695, %v1745_v63 }
 0x49e   : > { %v1656_v16 = vmul.f32 %v2855_v21, %v1640_v59 }
 0x49f   : > { %2531 = vmatmul.mubr.f32.gmra.mrb[4].mxu1 %v1895_v35  ;;  %v1808_v10 = vsub.f32 1.0, %v1792_v38  ;;  %v1513_v41 = vand.u32 2147483647, %v4473_v9  ;;  %vm1833_vm0 = vcmp.ge.f32.partialorder %v4473_v9, 0.0  ;;  %v1481_v35 = vmul.f32 0.5, %v4470_v24 }
 0x4a0   : > { %v1672_v42 = vadd.f32 -0.28449672, %v1656_v16 }
 0x4a1   : > { %v1840_v43 = vsub.f32 0.0, %v1808_v10  ;;  %v1529_v39 = vmul.f32 0.3275911, %v1513_v41  ;;  %v1737_v44 = vmul.f32 %v1513_v41, %v1513_v41 }
 0x4a2   : > { %v2859_v53 = vpop.eup %2858  ;;  %v1688_v52 = vmul.f32 %v2855_v21, %v1672_v42 }
 0x4a3   : > { %v1856_v34 = vsel %vm1824_vm13, %v1808_v10, %v1840_v43  ;;  %v1585_v8 = vmul.f32 1.0614054, %v2859_v53  ;;  %v1545_v40 = vadd.f32 1.0, %v1529_v39  ;;  %v2861_v55 = vpop.eup %2860  ;;  %v1753_v61 = vsub.f32 0.0, %v1737_v44  ;;  %v2318_v10 = vld [vmem:[%s4759_s27] ss:$0 sm:$0xff] }
 0x4a4   : > { %v1872_v57 = vadd.f32 1.0, %v1856_v34  ;;  %v1704_v48 = vadd.f32 0.2548296, %v1688_v52  ;;  %s3022_s27 = scalar_lea.vmem %s3021_s11, 4096 }
 0x4a5   : > { %v1601_v27 = vadd.f32 -1.4531521, %v1585_v8  ;;  %2862 = vrcp.f32 %v1545_v40  ;;  %v1784_v62 = vmul.f32 1.442695, %v1753_v61  ;;  %p3024_p9 = scmp.lt.s32.totalorder %s3022_s27, %s3016_s6 }
 0x4a6   : > { %v1888_v12 = vmul.f32 %v1872_v57, %v1472_v60  ;;  %v1720_v37 = vmul.f32 %v2855_v21, %v1704_v48  ;;  %2864 = vpow2.f32 %v1768_v32 }
 0x4a7   : > { %v1617_v47 = vmul.f32 %v2859_v53, %v1601_v27  ;;  %2866 = vpow2.f32 %v1784_v62  ;;  %p3025_p11 = por %p3024_p9, %p3023_p6 }
 0x4a8   : > { %2521 = vmatprep.mubr.f32.mxu0 %v1888_v12  ;;  %v1800_v4 = vmul.f32 %v2861_v55, %v1720_v37 }
 0x4a9   : > { %v1633_v22 = vadd.f32 1.4214138, %v1617_v47  ;;  %p3026_p3 = pnand %p3025_p11, %p3019_p5 }
 0x4aa   : > { %v1816_v49 = vsub.f32 1.0, %v1800_v4 }
 0x4ab   : > { %v1649_v45 = vmul.f32 %v2859_v53, %v1633_v22 }
 0x4ac   : > { %v1848_v50 = vsub.f32 0.0, %v1816_v49 }
 0x4ad   : > { %v1665_v17 = vadd.f32 -0.28449672, %v1649_v45 }
 0x4ae   : > { %v1864_v30 = vsel %vm1832_vm14, %v1816_v49, %v1848_v50 }
 0x4af   : > { %v2863_v6 = vpop.eup %2862  ;;  %v1880_v56 = vadd.f32 1.0, %v1864_v30  ;;  %v1681_v31 = vmul.f32 %v2859_v53, %v1665_v17 }
 0x4b0   : > { %v1593_v21 = vmul.f32 1.0614054, %v2863_v6  ;;  %v2865_v25 = vpop.eup %2864 }
 0x4b1   : > { %v1896_v0 = vmul.f32 %v1880_v56, %v1480_v18  ;;  %v1697_v14 = vadd.f32 0.2548296, %v1681_v31  ;;  %v2867_v7 = vpop.eup %2866 }
 0x4b2   : > { %v1609_v20 = vadd.f32 -1.4531521, %v1593_v21 }
 0x4b3   : > { %2533 = vmatprep.mubr.f32.mxu1 %v1896_v0  ;;  %v1713_v15 = vmul.f32 %v2859_v53, %v1697_v14 }
 0x4b4   : > { %v1625_v3 = vmul.f32 %v2863_v6, %v1609_v20 }
 0x4b5   : > { %v1793_v33 = vmul.f32 %v2865_v25, %v1713_v15 }
 0x4b6   : > { %v1641_v13 = vadd.f32 1.4214138, %v1625_v3 }
 0x4b7   : > { %v1809_v46 = vsub.f32 1.0, %v1793_v33 }
 0x4b8   : > { %v1657_v19 = vmul.f32 %v2863_v6, %v1641_v13 }
 0x4b9   : > { %v1841_v1 = vsub.f32 0.0, %v1809_v46 }
 0x4ba   : > { %v1673_v5 = vadd.f32 -0.28449672, %v1657_v19 }
 0x4bb   : > { %v1857_v28 = vsel %vm1825_vm15, %v1809_v46, %v1841_v1 }
 0x4bc   : > { %v1873_v54 = vadd.f32 1.0, %v1857_v28  ;;  %v1689_v29 = vmul.f32 %v2863_v6, %v1673_v5 }
 0x4be   : > { %v1889_v36 = vmul.f32 %v1873_v54, %v1473_v2  ;;  %v1705_v23 = vadd.f32 0.2548296, %v1689_v29 }
 0x4c0   : > { %2522 = vmatmul.mubr.f32.gmra.mrb[6].mxu0 %v1889_v36  ;;  %v1721_v58 = vmul.f32 %v2863_v6, %v1705_v23 }
 0x4c2   : > { %v1801_v59 = vmul.f32 %v2867_v7, %v1721_v58 }
 0x4c4   : > { %v1817_v11 = vsub.f32 1.0, %v1801_v59 }
 0x4c6   : > { %v1849_v51 = vsub.f32 0.0, %v1817_v11 }
 0x4c8   : > { %v1865_v26 = vsel %vm1833_vm0, %v1817_v11, %v1849_v51 }
 0x4c9   : > { %v1881_v38 = vadd.f32 1.0, %v1865_v26 }
 0x4cb   : > { %v1897_v16 = vmul.f32 %v1881_v38, %v1481_v35 }
 0x4cd   : > { %2534 = vmatmul.mubr.f32.gmra.mrb[6].mxu1 %v1897_v16 }
 0x515   : > { %v2514_v41 = vpop.f32.mrb[0].mxu0 }
 0x516   : > { %v1993_v42 = vadd.f32 %v2514_v41, %v2318_v10  ;;  %v1987_v63 = vpop.f32.mrb[1].mxu0 }
 0x517   : > { %v1988_v43 = vadd.f32 %v2318_v10, %v1987_v63 }
 0x518   : > { %2067 = vst [vmem:[%s3753_s26 + $0x8] sm:$0xff] %v1993_v42 }
 0x519   : > { %2066 = vst [vmem:[%s3753_s26] sm:$0xff] %v1988_v43  ;;  %v2526_v9 = vpop.f32.mrb[0].mxu1 }
 0x51a   : > { %v2033_v24 = vadd.f32 %v2526_v9, %v2318_v10  ;;  %v2027_v39 = vpop.f32.mrb[1].mxu1 }
 0x51b   : > { %v2028_v53 = vadd.f32 %v2318_v10, %v2027_v39 }
 0x51c   : > { %2075 = vst [vmem:[%s3753_s26 + $0x48] sm:$0xff] %v2033_v24 }
 0x51d   : > { %2074 = vst [vmem:[%s3753_s26 + $0x40] sm:$0xff] %v2028_v53 }
 0x538   : > { %v2517_v60 = vpop.f32.mrb[2].mxu0 }
 0x539   : > { %v2003_v52 = vadd.f32 %v2517_v60, %v2318_v10  ;;  %v1997_v34 = vpop.f32.mrb[3].mxu0 }
 0x53a   : > { %v1998_v8 = vadd.f32 %v2318_v10, %v1997_v34 }
 0x53b   : > { %2069 = vst [vmem:[%s3753_s26 + $0x18] sm:$0xff] %v2003_v52 }
 0x53c   : > { %2068 = vst [vmem:[%s3753_s26 + $0x10] sm:$0xff] %v1998_v8 }
 0x54c   : > { %v2529_v40 = vpop.f32.mrb[2].mxu1 }
 0x54d   : > { %v2043_v57 = vadd.f32 %v2529_v40, %v2318_v10  ;;  %v2037_v48 = vpop.f32.mrb[3].mxu1 }
 0x54e   : > { %v2038_v32 = vadd.f32 %v2318_v10, %v2037_v48 }
 0x54f   : > { %2077 = vst [vmem:[%s3753_s26 + $0x58] sm:$0xff] %v2043_v57 }
 0x550   : > { %2076 = vst [vmem:[%s3753_s26 + $0x50] sm:$0xff] %v2038_v32 }
 0x568   : > { %v2520_v55 = vpop.f32.mrb[4].mxu0 }
 0x569   : > { %v2013_v27 = vadd.f32 %v2520_v55, %v2318_v10  ;;  %v2007_v12 = vpop.f32.mrb[5].mxu0 }
 0x56a   : > { %v2008_v37 = vadd.f32 %v2318_v10, %v2007_v12 }
 0x56b   : > { %2071 = vst [vmem:[%s3753_s26 + $0x28] sm:$0xff] %v2013_v27 }
 0x56c   : > { %2070 = vst [vmem:[%s3753_s26 + $0x20] sm:$0xff] %v2008_v37 }
 0x572   : > { %v2532_v47 = vpop.f32.mrb[4].mxu1 }
 0x573   : > { %v2053_v4 = vadd.f32 %v2532_v47, %v2318_v10  ;;  %v2047_v22 = vpop.f32.mrb[5].mxu1 }
 0x574   : > { %v2048_v44 = vadd.f32 %v2318_v10, %v2047_v22 }
 0x575   : > { %2079 = vst [vmem:[%s3753_s26 + $0x68] sm:$0xff] %v2053_v4 }
 0x576   : > { %2078 = vst [vmem:[%s3753_s26 + $0x60] sm:$0xff] %v2048_v44 }
 0x593   : > { %v2523_v49 = vpop.f32.mrb[6].mxu0 }
 0x594   : > { %v2023_v45 = vadd.f32 %v2523_v49, %v2318_v10  ;;  %v2017_v50 = vpop.f32.mrb[7].mxu0 }
 0x595   : > { %v2018_v18 = vadd.f32 %v2318_v10, %v2017_v50 }
 0x596   : > { %2073 = vst [vmem:[%s3753_s26 + $0x38] sm:$0xff] %v2023_v45 }
 0x597   : > { %2072 = vst [vmem:[%s3753_s26 + $0x30] sm:$0xff] %v2018_v18 }
 0x5a0   : > { %v2535_v17 = vpop.f32.mrb[6].mxu1 }
 0x5a1   : > { %v2063_v61 = vadd.f32 %v2535_v17, %v2318_v10  ;;  %v2057_v30 = vpop.f32.mrb[7].mxu1 }
 0x5a2   : > { %v2058_v6 = vadd.f32 %v2318_v10, %v2057_v30 }
 0x5a3   : > { %2081 = vst [vmem:[%s3753_s26 + $0x78] sm:$0xff] %v2063_v61 }
 0x5a4   : > { %2080 = vst [vmem:[%s3753_s26 + $0x70] sm:$0xff] %v2058_v6 }
 0x5a5   : > { %3029 = shalt.err (!%p3026_p3)
}
 0x5a6   : > { %s3030_s26 = scalar_lea.hbm %s4507_s9, 2048  ;;  %s3034_s0 = scalar_lea.hbm %s4762_s4, 8192 }
 0x5a7   : > { %p3031_p7 = scmp.ne.s32.totalorder %s4507_s9, %s3030_s26  ;;  %p3035_p12 = scmp.lt.u32.totalorder %s4507_s9, %s4762_s4 }
 0x5a8   : > { %p3036_p2 = scmp.lt.u32.totalorder %s3034_s0, %s3030_s26  ;;  %p3038_p13 = scmp.lt.u32.totalorder %s3030_s26, %s4507_s9 }
 0x5a9   : > { %p3032_p4 = pnand %p3031_p7, %p4763_p1 }
 0x5aa   : > { %p3037_p0 = por %p3036_p2, %p3035_p12 }
 0x5ab   : > { %p3033_p10 = pneg %p3032_p4 }
 0x5ac   : > { %p3039_p8 = por %p3038_p13, %p3037_p0 }
 0x5ae   : > { %p3040_p5 = pnand %p3039_p8, %p3033_p10 }
 0x5b0   : > { %3043 = shalt.err (!%p3040_p5)
}
 0x5b1   : > { %s3187_s10 = smov 128   ;;  %s3188_s1 = smov 8  }
 0x5b2   : > { %2654 = dma.vmem_to_hbm [thread:$0]  (%p4763_p1), %s4509_s13, 2048, %s4507_s9, %s2083_s23, %s3187_s10, %s3187_s10, %s3188_s1  }
 0x5b3 PF: > { %p2682_p6 = scmp.ge.s32.totalorder %s3174_s22, 2  ;;  %s2113_s24 = sand.u32 1, %s3146_s15  }
 0x5b4   : > { %p4764_p9 = scmp.ne.s32.totalorder %s4691_s2, 0  ;;  %s2114_s6 = scalar_lea.sflag [#allocation5], %s2113_s24 }
 0x5b6   : > { %p2674_p11 = pnand %p2682_p6, %p4764_p9 }
 0x5b8   : > { %3117 = dma.done.wait (!%p2674_p11), %s2114_s6, 2048  }
 0x5b9   : > { %3119 = vsyncadd (!%p2674_p11), %s2114_s6, 4294965248  ;;  %s29_s22 = sadd.s32 1, %s3174_s22   ;;  %s4766_s30 = sld [smem:[#allocation19_spill]] }
 0x5ba   : > { %p4542_p3 = scmp.ge.s32.totalorder %s29_s22, 6   ;;  %s4767_s10 = sld [smem:[#allocation20_spill]] }
 0x5bb   : > { %s4768_s25 = sld [smem:[#allocation21_spill]]  ;;  %s4769_s28 = smov %s3399_s12 }
 0x5bc   : > { %s4770_s2 = sld [smem:[#allocation24_spill]]  ;;  %s4771_s9 = sld [smem:[#allocation25_spill]] }
 0x5bd   : > { %s4772_s20 = sld [smem:[#allocation27_spill]]  ;;  %s4773_s21 = sld [smem:[#allocation28_spill]] }
 0x5be   : > { %s4775_s11 = smov %s4799_s19  ;;  %s4777_s13 = smov %s3142_s14 }
 0x5bf   : > { %s4778_s14 = smov %s4769_s28  ;;  %s4779_s15 = smov %s3150_s16 }
 0x5c0   : > { %s4780_s16 = smov %s3154_s17  ;;  %s4781_s17 = smov %s3490_s29 }
 0x5c1   : > { %s4776_s12 = smov %s4768_s25  ;;  %28 = sbr.rel (!%p4542_p3) target bundleno = 24 (0x18), region = 153 }
 0x5c2   : > { %s4782_s18 = smov %s4770_s2  ;;  %s4783_s19 = smov %s4771_s9 }
 0x5c8   :  { %2119 = vsyncpa [#allocation4], 1 }
 0x5c9   :  { %2121 = vsyncpa [#allocation4 + $0x1], 1 }
 0x5ca   :  { %2122 = vsyncpa [#allocation7], 1 }
 0x5cb   :  { %2124 = vsyncpa [#allocation7 + $0x1], 1 }
 0x5cc   :  { %2125 = vsyncpa [#allocation10], 1 }
 0x5cd   :  { %2126 = vsyncpa [#allocation5], 1 }
 0x5ce   :  { %2128 = vsyncpa [#allocation5 + $0x1], 1 }

</bundles_post_ra>
